<compile_context>
chip_gen: v7x
topology: tpu7x:2x2x1
jax: 0.10.0
libtpu: 0.0.40
codegen_flags: <defaults>
</compile_context>

<pallas_src>
import functools

import jax
import jax.numpy as jnp
from jax.experimental import pallas as pl
from jax.experimental.pallas import tpu as pltpu


# ----------------------------- fused Pallas kernel ---------------------------


def _tide_fused_kernel(x_ref, lb_ref, wp_ref, bp_ref,
                       w1s_ref, b1s_ref, w2s_ref, b2s_ref, g_ref, be_ref,
                       tw1_ref, tb1_ref, tw2_ref, tb2_ref,
                       twr_ref, tbr_ref, tg_ref, tbe_ref,
                       ws_ref, bs_ref,
                       pred_ref, skip_ref,
                       *, hidden, out_dim, num_layers, compute_dtype):
    """Fused TiDE forward for one row tile.

    Padded lane columns of every intermediate are kept exactly zero
    (zero-padded weights/biases, zero-padded gamma/beta), so LayerNorm can use
    sums over the full padded width divided by the logical feature count.
    """

    def dot(a, b):
        # bf16 (or f32) MXU inputs, f32 accumulation.
        return jnp.dot(a.astype(compute_dtype), b.astype(compute_dtype),
                       preferred_element_type=jnp.float32)

    def layernorm(y, d, gamma, beta):
        # y has exact zeros in padded columns -> sums only see the d valid cols.
        mu = jnp.sum(y, axis=-1, keepdims=True) / d
        var = jnp.sum(y * y, axis=-1, keepdims=True) / d - mu * mu
        return (y - mu) * jax.lax.rsqrt(var + 1e-5) * gamma + beta

    # 1. feature projection of the last lookback step (only step consumed).
    x = dot(x_ref[...], wp_ref[...]) + bp_ref[...]            # [TB, H_PAD], f32

    # 2-3. dense encoder + dense decoder: identity residual blocks (unrolled).
    for i in range(num_layers):
        h = jnp.maximum(dot(x, w1s_ref[i]) + b1s_ref[i], 0.0)  # ReLU
        y = dot(h, w2s_ref[i]) + b2s_ref[i] + x                # dropout = identity
        x = layernorm(y, hidden, g_ref[i], be_ref[i])

    # 4. temporal decoder (hidden -> output, linear residual projection),
    #    computed once per batch row (all horizon rows are identical).
    res = dot(x, twr_ref[...]) + tbr_ref[...]
    h = jnp.maximum(dot(x, tw1_ref[...]) + tb1_ref[...], 0.0)
    y = dot(h, tw2_ref[...]) + tb2_ref[...] + res
    pred_ref[...] = layernorm(y, out_dim, tg_ref[...], tbe_ref[...])

    # 5. lookback skip connection: [TB, L*Fin] @ [L*Fin, HO_PAD]
    skip_ref[...] = dot(lb_ref[...], ws_ref[...]) + bs_ref[...]


# ----------------------------- helpers ---------------------------------------


def _round_up(x, m):
    return ((x + m - 1) // m) * m


def _pad2(a, rows, cols):
    return jnp.pad(a, ((0, rows - a.shape[0]), (0, cols - a.shape[1])))


# ----------------------------- TiDE forward (wrapper) ------------------------


@functools.partial(jax.jit,
                   static_argnames=("horizon_length", "output_size",
                                    "compute_dtype"))
def tide_forward(params, lookback, *, horizon_length, output_size,
                 compute_dtype=jnp.bfloat16):
    # lookback: [B, L, input_size]
    B, L, Fin = lookback.shape
    wp, bp = params["feature_projection"]
    hidden = wp.shape[1]
    exp_hidden = params["encoder"][0]["w1"].shape[1]

    # lane-dense padded widths
    H_PAD = _round_up(hidden, 128)
    E_PAD = _round_up(exp_hidden, 128)
    O_PAD = _round_up(output_size, 128)
    HO_PAD = _round_up(horizon_length * output_size, 128)

    # row tiling (sublane multiple of 8; pipeline + megacore when B grows)
    TB = min(_round_up(B, 8), 256)
    B_pad = _round_up(B, TB)
    n_row_tiles = B_pad // TB

    # ---- pad / stack parameters (zeros in padded lanes; gamma/beta -> 0) ----
    wp_p = _pad2(wp, Fin, H_PAD)
    bp_p = _pad2(bp, 1, H_PAD)

    enc_dec = list(params["encoder"]) + list(params["decoder"])
    w1s = jnp.stack([_pad2(p["w1"], H_PAD, E_PAD) for p in enc_dec])
    b1s = jnp.stack([_pad2(p["b1"], 1, E_PAD) for p in enc_dec])
    w2s = jnp.stack([_pad2(p["w2"], E_PAD, H_PAD) for p in enc_dec])
    b2s = jnp.stack([_pad2(p["b2"], 1, H_PAD) for p in enc_dec])
    gs = jnp.stack([_pad2(p["gamma"], 1, H_PAD) for p in enc_dec])
    bes = jnp.stack([_pad2(p["beta"], 1, H_PAD) for p in enc_dec])

    td = params["temporal_decoder"]
    tw1 = _pad2(td["w1"], H_PAD, E_PAD)
    tb1 = _pad2(td["b1"], 1, E_PAD)
    tw2 = _pad2(td["w2"], E_PAD, O_PAD)
    tb2 = _pad2(td["b2"], 1, O_PAD)
    twr = _pad2(td["wr"], H_PAD, O_PAD)
    tbr = _pad2(td["br"], 1, O_PAD)
    tg = _pad2(td["gamma"], 1, O_PAD)
    tbe = _pad2(td["beta"], 1, O_PAD)

    ws, bs = params["lookback_skip"]
    ws_p = _pad2(ws, L * Fin, HO_PAD)
    bs_p = _pad2(bs, 1, HO_PAD)

    # ---- activations: only the last lookback step is consumed upstream ----
    x_last = lookback[:, -1, :]                       # [B, Fin]
    lb_flat = lookback.reshape(B, L * Fin)            # [B, L*Fin]
    x_last = jnp.pad(x_last, ((0, B_pad - B), (0, 0)))
    lb_flat = jnp.pad(lb_flat, ((0, B_pad - B), (0, 0)))

    kernel = functools.partial(
        _tide_fused_kernel, hidden=hidden, out_dim=output_size,
        num_layers=len(enc_dec), compute_dtype=compute_dtype)

    def full(a):   # whole-array block, constant index -> fetched once
        return pl.BlockSpec(a.shape, lambda r, nd=a.ndim: (0,) * nd)

    def row(cols):  # row-tiled activation block
        return pl.BlockSpec((TB, cols), lambda r: (r, 0))

    pred_pad, skip_pad = pl.pallas_call(
        kernel,
        out_shape=(jax.ShapeDtypeStruct((B_pad, O_PAD), jnp.float32),
                   jax.ShapeDtypeStruct((B_pad, HO_PAD), jnp.float32)),
        grid=(n_row_tiles,),
        in_specs=[row(Fin), row(L * Fin),
                  full(wp_p), full(bp_p),
                  full(w1s), full(b1s), full(w2s), full(b2s),
                  full(gs), full(bes),
                  full(tw1), full(tb1), full(tw2), full(tb2),
                  full(twr), full(tbr), full(tg), full(tbe),
                  full(ws_p), full(bs_p)],
        out_specs=(pl.BlockSpec((TB, O_PAD), lambda r: (r, 0)),
                   pl.BlockSpec((TB, HO_PAD), lambda r: (r, 0))),
        compiler_params=pltpu.CompilerParams(
            dimension_semantics=("parallel",)),
    )(x_last, lb_flat, wp_p, bp_p, w1s, b1s, w2s, b2s, gs, bes,
      tw1, tb1, tw2, tb2, twr, tbr, tg, tbe, ws_p, bs_p)

    # tiny epilogue: broadcast per-batch temporal-decoder output over horizon
    # and add the per-horizon lookback skip.
    pred_unit = pred_pad[:B, :output_size]                       # [B, out]
    skip = skip_pad[:B, :horizon_length * output_size].reshape(
        B, horizon_length, output_size)
    return pred_unit[:, None, :] + skip


# ----------------------------- parameter init --------------------------------


def _init_linear(key, din, dout, scale=0.05):
    kw, kb = jax.random.split(key)
    w = jax.random.normal(kw, (din, dout), jnp.float32) * scale
    b = jax.random.normal(kb, (1, dout), jnp.float32) * scale
    return w, b


def _init_resblock(key, din, dout, hidden):
    k1, k2, k3 = jax.random.split(key, 3)
    w1, b1 = _init_linear(k1, din, hidden)
    w2, b2 = _init_linear(k2, hidden, dout)
    p = {"w1": w1, "b1": b1, "w2": w2, "b2": b2,
         "gamma": jnp.ones((1, dout), jnp.float32),
         "beta": jnp.zeros((1, dout), jnp.float32)}
    if din != dout:
        wr, br = _init_linear(k3, din, dout)
        p["wr"] = wr
        p["br"] = br
    return p


def init_tide_params(key, *, input_size, output_size, hidden_size,
                     lookback_length, horizon_length,
                     num_encoder_layers=3, num_decoder_layers=3,
                     expansion_factor=4):
    keys = jax.random.split(key, 4 + num_encoder_layers + num_decoder_layers)
    ki = iter(keys)
    params = {}
    params["feature_projection"] = _init_linear(next(ki), input_size,
                                                hidden_size)
    params["encoder"] = [
        _init_resblock(next(ki), hidden_size, hidden_size,
                       hidden_size * expansion_factor)
        for _ in range(num_encoder_layers)
    ]
    params["decoder"] = [
        _init_resblock(next(ki), hidden_size, hidden_size,
                       hidden_size * expansion_factor)
        for _ in range(num_decoder_layers)
    ]
    params["temporal_decoder"] = _init_resblock(
        next(ki), hidden_size, output_size, hidden_size * expansion_factor)
    params["lookback_skip"] = _init_linear(
        next(ki), lookback_length * input_size,
        horizon_length * output_size)
    return params


# ----------------------------- pure-JAX reference ----------------------------


def _make_dot(compute_dtype):
    def dot(a, b):
        return jnp.dot(a.astype(compute_dtype), b.astype(compute_dtype),
                       preferred_element_type=jnp.float32)
    return dot


def _ref_resblock(x, p, dot):
    res = (dot(x, p["wr"]) + p["br"]) if "wr" in p else x
    h = jnp.maximum(dot(x, p["w1"]) + p["b1"], 0.0)
    y = dot(h, p["w2"]) + p["b2"] + res
    mu = jnp.mean(y, axis=-1, keepdims=True)
    var = jnp.mean((y - mu) ** 2, axis=-1, keepdims=True)
    return (y - mu) / jnp.sqrt(var + 1e-5) * p["gamma"] + p["beta"]


def tide_forward_ref(params, lookback, *, horizon_length, output_size,
                     compute_dtype=jnp.float32):
    # Faithful (unoptimized) reference: per-timestep projection and
    # per-horizon temporal decoder, exactly like the PyTorch module.
    dot = _make_dot(compute_dtype)
    B, L, Fin = lookback.shape
    wp, bp = params["feature_projection"]
    proj = dot(lookback.reshape(B * L, Fin), wp) + bp
    hidden = wp.shape[1]
    x = proj.reshape(B, L, hidden)[:, -1, :]
    for p in params["encoder"]:
        x = _ref_resblock(x, p, dot)
    for p in params["decoder"]:
        x = _ref_resblock(x, p, dot)
    dec_exp = jnp.broadcast_to(x[:, None, :], (B, horizon_length, hidden))
    pred = _ref_resblock(dec_exp.reshape(B * horizon_length, hidden),
                         params["temporal_decoder"], dot)
    pred = pred.reshape(B, horizon_length, output_size)
    ws, bs = params["lookback_skip"]
    skip = (dot(lookback.reshape(B, L * Fin), ws) + bs).reshape(
        B, horizon_length, output_size)
    return pred + skip


# ----------------------------- main -------------------------------------------


if __name__ == "__main__":
    B = 2
    input_size = 4
    output_size = 3
    hidden_size = 32
    lookback_length = 8
    horizon_length = 6

    key = jax.random.PRNGKey(0)
    kp, kx = jax.random.split(key)
    params = init_tide_params(
        kp,
        input_size=input_size, output_size=output_size,
        hidden_size=hidden_size,
        lookback_length=lookback_length, horizon_length=horizon_length,
        num_encoder_layers=3, num_decoder_layers=3, expansion_factor=4,
    )
    lookback = jax.random.normal(kx, (B, lookback_length, input_size),
                                 jnp.float32)

    out = tide_forward(params, lookback,
                       horizon_length=horizon_length,
                       output_size=output_size,
                       compute_dtype=jnp.bfloat16)
    out = jax.block_until_ready(out)
    assert out.shape == (B, horizon_length, output_size), out.shape

    # 1) precision-matched reference (bf16 dot inputs, f32 elsewhere): tight.
    ref_bf16 = tide_forward_ref(params, lookback,
                                horizon_length=horizon_length,
                                output_size=output_size,
                                compute_dtype=jnp.bfloat16)
    assert jnp.allclose(out, ref_bf16, atol=2e-3, rtol=2e-3), (
        float(jnp.max(jnp.abs(out - ref_bf16))))

    # 2) full-f32 reference (module semantics): loose bound for bf16 matmuls.
    ref_f32 = tide_forward_ref(params, lookback,
                               horizon_length=horizon_length,
                               output_size=output_size,
                               compute_dtype=jnp.float32)
    assert jnp.allclose(out, ref_f32, atol=1e-1, rtol=1e-1), (
        float(jnp.max(jnp.abs(out - ref_f32))))

    print("KERNEL_OK")
</pallas_src>

<mosaic_0001>
module attributes {stable_mosaic.version = 11 : i64} {
  func.func @_tide_fused_kernel(%arg0: i32, %arg1: memref<8x4xf32, #tpu.memory_space<vmem>>, %arg2: memref<8x32xf32, #tpu.memory_space<vmem>>, %arg3: memref<4x128xf32, #tpu.memory_space<vmem>>, %arg4: memref<1x128xf32, #tpu.memory_space<vmem>>, %arg5: memref<6x128x128xf32, #tpu.memory_space<vmem>>, %arg6: memref<6x1x128xf32, #tpu.memory_space<vmem>>, %arg7: memref<6x128x128xf32, #tpu.memory_space<vmem>>, %arg8: memref<6x1x128xf32, #tpu.memory_space<vmem>>, %arg9: memref<6x1x128xf32, #tpu.memory_space<vmem>>, %arg10: memref<6x1x128xf32, #tpu.memory_space<vmem>>, %arg11: memref<128x128xf32, #tpu.memory_space<vmem>>, %arg12: memref<1x128xf32, #tpu.memory_space<vmem>>, %arg13: memref<128x128xf32, #tpu.memory_space<vmem>>, %arg14: memref<1x128xf32, #tpu.memory_space<vmem>>, %arg15: memref<128x128xf32, #tpu.memory_space<vmem>>, %arg16: memref<1x128xf32, #tpu.memory_space<vmem>>, %arg17: memref<1x128xf32, #tpu.memory_space<vmem>>, %arg18: memref<1x128xf32, #tpu.memory_space<vmem>>, %arg19: memref<32x128xf32, #tpu.memory_space<vmem>>, %arg20: memref<1x128xf32, #tpu.memory_space<vmem>>, %arg21: memref<8x128xf32, #tpu.memory_space<vmem>>, %arg22: memref<8x128xf32, #tpu.memory_space<vmem>>) attributes {dimension_semantics = [#tpu.dimension_semantics<parallel>], iteration_bounds = array<i64: 1>, scalar_prefetch = 0 : i64, scratch_operands = 0 : i64, tpu.core_type = #tpu.core_type<tc>, window_params = [{transform_indices = @transform_0, window_bounds = array<i64: 8, 4>}, {transform_indices = @transform_1, window_bounds = array<i64: 8, 32>}, {pipeline_mode = #tpu.pipeline_mode<synchronous>, transform_indices = @transform_2, window_bounds = array<i64: 4, 128>}, {pipeline_mode = #tpu.pipeline_mode<synchronous>, transform_indices = @transform_3, window_bounds = array<i64: 1, 128>}, {pipeline_mode = #tpu.pipeline_mode<synchronous>, transform_indices = @transform_4, window_bounds = array<i64: 6, 128, 128>}, {pipeline_mode = #tpu.pipeline_mode<synchronous>, transform_indices = @transform_5, window_bounds = array<i64: 6, 1, 128>}, {pipeline_mode = #tpu.pipeline_mode<synchronous>, transform_indices = @transform_6, window_bounds = array<i64: 6, 128, 128>}, {pipeline_mode = #tpu.pipeline_mode<synchronous>, transform_indices = @transform_7, window_bounds = array<i64: 6, 1, 128>}, {pipeline_mode = #tpu.pipeline_mode<synchronous>, transform_indices = @transform_8, window_bounds = array<i64: 6, 1, 128>}, {pipeline_mode = #tpu.pipeline_mode<synchronous>, transform_indices = @transform_9, window_bounds = array<i64: 6, 1, 128>}, {pipeline_mode = #tpu.pipeline_mode<synchronous>, transform_indices = @transform_10, window_bounds = array<i64: 128, 128>}, {pipeline_mode = #tpu.pipeline_mode<synchronous>, transform_indices = @transform_11, window_bounds = array<i64: 1, 128>}, {pipeline_mode = #tpu.pipeline_mode<synchronous>, transform_indices = @transform_12, window_bounds = array<i64: 128, 128>}, {pipeline_mode = #tpu.pipeline_mode<synchronous>, transform_indices = @transform_13, window_bounds = array<i64: 1, 128>}, {pipeline_mode = #tpu.pipeline_mode<synchronous>, transform_indices = @transform_14, window_bounds = array<i64: 128, 128>}, {pipeline_mode = #tpu.pipeline_mode<synchronous>, transform_indices = @transform_15, window_bounds = array<i64: 1, 128>}, {pipeline_mode = #tpu.pipeline_mode<synchronous>, transform_indices = @transform_16, window_bounds = array<i64: 1, 128>}, {pipeline_mode = #tpu.pipeline_mode<synchronous>, transform_indices = @transform_17, window_bounds = array<i64: 1, 128>}, {pipeline_mode = #tpu.pipeline_mode<synchronous>, transform_indices = @transform_18, window_bounds = array<i64: 32, 128>}, {pipeline_mode = #tpu.pipeline_mode<synchronous>, transform_indices = @transform_19, window_bounds = array<i64: 1, 128>}, {transform_indices = @transform_20, window_bounds = array<i64: 8, 128>}, {transform_indices = @transform_21, window_bounds = array<i64: 8, 128>}]} {
    %c0 = arith.constant 0 : index
    %c0_0 = arith.constant 0 : index
    %0 = vector.load %arg1[%c0, %c0_0] : memref<8x4xf32, #tpu.memory_space<vmem>>, vector<8x4xf32>
    %c0_1 = arith.constant 0 : index
    %c0_2 = arith.constant 0 : index
    %1 = vector.load %arg3[%c0_1, %c0_2] : memref<4x128xf32, #tpu.memory_space<vmem>>, vector<4x128xf32>
    %2 = arith.truncf %0 : vector<8x4xf32> to vector<8x4xbf16>
    %3 = arith.truncf %1 : vector<4x128xf32> to vector<4x128xbf16>
    %cst = arith.constant dense<0.000000e+00> : vector<8x128xf32>
    %4 = tpu.matmul %2, %3, %cst {dimension_numbers = #tpu.dot_dimension_numbers<[1], [0], [0], [1], [0, 0, 1, 1], [], []>} : vector<8x4xbf16>, vector<4x128xbf16>, vector<8x128xf32> -> vector<8x128xf32>
    %c0_3 = arith.constant 0 : index
    %c0_4 = arith.constant 0 : index
    %5 = vector.load %arg4[%c0_3, %c0_4] : memref<1x128xf32, #tpu.memory_space<vmem>>, vector<1x128xf32>
    %6 = vector.broadcast %5 : vector<1x128xf32> to vector<8x128xf32>
    %7 = arith.addf %4, %6 : vector<8x128xf32>
    %c0_5 = arith.constant 0 : index
    %c0_6 = arith.constant 0 : index
    %c0_7 = arith.constant 0 : index
    %8 = vector.load %arg5[%c0_5, %c0_6, %c0_7] : memref<6x128x128xf32, #tpu.memory_space<vmem>>, vector<1x128x128xf32>
    %9 = vector.shape_cast %8 : vector<1x128x128xf32> to vector<128x128xf32>
    %10 = arith.truncf %7 : vector<8x128xf32> to vector<8x128xbf16>
    %11 = arith.truncf %9 : vector<128x128xf32> to vector<128x128xbf16>
    %cst_8 = arith.constant dense<0.000000e+00> : vector<8x128xf32>
    %12 = tpu.matmul %10, %11, %cst_8 {dimension_numbers = #tpu.dot_dimension_numbers<[1], [0], [0], [1], [0, 0, 1, 1], [], []>} : vector<8x128xbf16>, vector<128x128xbf16>, vector<8x128xf32> -> vector<8x128xf32>
    %c0_9 = arith.constant 0 : index
    %c0_10 = arith.constant 0 : index
    %c0_11 = arith.constant 0 : index
    %13 = vector.load %arg6[%c0_9, %c0_10, %c0_11] : memref<6x1x128xf32, #tpu.memory_space<vmem>>, vector<1x1x128xf32>
    %14 = vector.shape_cast %13 : vector<1x1x128xf32> to vector<1x128xf32>
    %15 = vector.broadcast %14 : vector<1x128xf32> to vector<8x128xf32>
    %16 = arith.addf %12, %15 : vector<8x128xf32>
    %cst_12 = arith.constant 0.000000e+00 : f32
    %17 = vector.broadcast %cst_12 : f32 to vector<8x128xf32>
    %18 = arith.maximumf %16, %17 : vector<8x128xf32>
    %c0_13 = arith.constant 0 : index
    %c0_14 = arith.constant 0 : index
    %c0_15 = arith.constant 0 : index
    %19 = vector.load %arg7[%c0_13, %c0_14, %c0_15] : memref<6x128x128xf32, #tpu.memory_space<vmem>>, vector<1x128x128xf32>
    %20 = vector.shape_cast %19 : vector<1x128x128xf32> to vector<128x128xf32>
    %21 = arith.truncf %18 : vector<8x128xf32> to vector<8x128xbf16>
    %22 = arith.truncf %20 : vector<128x128xf32> to vector<128x128xbf16>
    %cst_16 = arith.constant dense<0.000000e+00> : vector<8x128xf32>
    %23 = tpu.matmul %21, %22, %cst_16 {dimension_numbers = #tpu.dot_dimension_numbers<[1], [0], [0], [1], [0, 0, 1, 1], [], []>} : vector<8x128xbf16>, vector<128x128xbf16>, vector<8x128xf32> -> vector<8x128xf32>
    %c0_17 = arith.constant 0 : index
    %c0_18 = arith.constant 0 : index
    %c0_19 = arith.constant 0 : index
    %24 = vector.load %arg8[%c0_17, %c0_18, %c0_19] : memref<6x1x128xf32, #tpu.memory_space<vmem>>, vector<1x1x128xf32>
    %25 = vector.shape_cast %24 : vector<1x1x128xf32> to vector<1x128xf32>
    %26 = vector.broadcast %25 : vector<1x128xf32> to vector<8x128xf32>
    %27 = arith.addf %23, %26 : vector<8x128xf32>
    %28 = arith.addf %27, %7 : vector<8x128xf32>
    %c0_20 = arith.constant 0 : index
    %c0_21 = arith.constant 0 : index
    %c0_22 = arith.constant 0 : index
    %29 = vector.load %arg9[%c0_20, %c0_21, %c0_22] : memref<6x1x128xf32, #tpu.memory_space<vmem>>, vector<1x1x128xf32>
    %30 = vector.shape_cast %29 : vector<1x1x128xf32> to vector<1x128xf32>
    %c0_23 = arith.constant 0 : index
    %c0_24 = arith.constant 0 : index
    %c0_25 = arith.constant 0 : index
    %31 = vector.load %arg10[%c0_23, %c0_24, %c0_25] : memref<6x1x128xf32, #tpu.memory_space<vmem>>, vector<1x1x128xf32>
    %32 = vector.shape_cast %31 : vector<1x1x128xf32> to vector<1x128xf32>
    %cst_26 = arith.constant dense<0.000000e+00> : vector<8xf32>
    %33 = vector.multi_reduction <add>, %28, %cst_26 [1] : vector<8x128xf32> to vector<8xf32>
    %34 = vector.shape_cast %33 : vector<8xf32> to vector<8x1xf32>
    %cst_27 = arith.constant 3.200000e+01 : f32
    %35 = vector.broadcast %cst_27 : f32 to vector<8x1xf32>
    %36 = arith.divf %34, %35 : vector<8x1xf32>
    %37 = arith.mulf %28, %28 : vector<8x128xf32>
    %cst_28 = arith.constant dense<0.000000e+00> : vector<8xf32>
    %38 = vector.multi_reduction <add>, %37, %cst_28 [1] : vector<8x128xf32> to vector<8xf32>
    %39 = vector.shape_cast %38 : vector<8xf32> to vector<8x1xf32>
    %cst_29 = arith.constant 3.200000e+01 : f32
    %40 = vector.broadcast %cst_29 : f32 to vector<8x1xf32>
    %41 = arith.divf %39, %40 : vector<8x1xf32>
    %42 = arith.mulf %36, %36 : vector<8x1xf32>
    %43 = arith.subf %41, %42 : vector<8x1xf32>
    %44 = vector.broadcast %36 : vector<8x1xf32> to vector<8x128xf32>
    %45 = arith.subf %28, %44 : vector<8x128xf32>
    %cst_30 = arith.constant 9.99999974E-6 : f32
    %46 = vector.broadcast %cst_30 : f32 to vector<8x1xf32>
    %47 = arith.addf %43, %46 : vector<8x1xf32>
    %48 = math.rsqrt %47 : vector<8x1xf32>
    %49 = vector.broadcast %48 : vector<8x1xf32> to vector<8x128xf32>
    %50 = arith.mulf %45, %49 : vector<8x128xf32>
    %51 = vector.broadcast %30 : vector<1x128xf32> to vector<8x128xf32>
    %52 = arith.mulf %50, %51 : vector<8x128xf32>
    %53 = vector.broadcast %32 : vector<1x128xf32> to vector<8x128xf32>
    %54 = arith.addf %52, %53 : vector<8x128xf32>
    %c1 = arith.constant 1 : index
    %c0_31 = arith.constant 0 : index
    %c0_32 = arith.constant 0 : index
    %55 = vector.load %arg5[%c1, %c0_31, %c0_32] : memref<6x128x128xf32, #tpu.memory_space<vmem>>, vector<1x128x128xf32>
    %56 = vector.shape_cast %55 : vector<1x128x128xf32> to vector<128x128xf32>
    %57 = arith.truncf %54 : vector<8x128xf32> to vector<8x128xbf16>
    %58 = arith.truncf %56 : vector<128x128xf32> to vector<128x128xbf16>
    %cst_33 = arith.constant dense<0.000000e+00> : vector<8x128xf32>
    %59 = tpu.matmul %57, %58, %cst_33 {dimension_numbers = #tpu.dot_dimension_numbers<[1], [0], [0], [1], [0, 0, 1, 1], [], []>} : vector<8x128xbf16>, vector<128x128xbf16>, vector<8x128xf32> -> vector<8x128xf32>
    %c1_34 = arith.constant 1 : index
    %c0_35 = arith.constant 0 : index
    %c0_36 = arith.constant 0 : index
    %60 = vector.load %arg6[%c1_34, %c0_35, %c0_36] : memref<6x1x128xf32, #tpu.memory_space<vmem>>, vector<1x1x128xf32>
    %61 = vector.shape_cast %60 : vector<1x1x128xf32> to vector<1x128xf32>
    %62 = vector.broadcast %61 : vector<1x128xf32> to vector<8x128xf32>
    %63 = arith.addf %59, %62 : vector<8x128xf32>
    %cst_37 = arith.constant 0.000000e+00 : f32
    %64 = vector.broadcast %cst_37 : f32 to vector<8x128xf32>
    %65 = arith.maximumf %63, %64 : vector<8x128xf32>
    %c1_38 = arith.constant 1 : index
    %c0_39 = arith.constant 0 : index
    %c0_40 = arith.constant 0 : index
    %66 = vector.load %arg7[%c1_38, %c0_39, %c0_40] : memref<6x128x128xf32, #tpu.memory_space<vmem>>, vector<1x128x128xf32>
    %67 = vector.shape_cast %66 : vector<1x128x128xf32> to vector<128x128xf32>
    %68 = arith.truncf %65 : vector<8x128xf32> to vector<8x128xbf16>
    %69 = arith.truncf %67 : vector<128x128xf32> to vector<128x128xbf16>
    %cst_41 = arith.constant dense<0.000000e+00> : vector<8x128xf32>
    %70 = tpu.matmul %68, %69, %cst_41 {dimension_numbers = #tpu.dot_dimension_numbers<[1], [0], [0], [1], [0, 0, 1, 1], [], []>} : vector<8x128xbf16>, vector<128x128xbf16>, vector<8x128xf32> -> vector<8x128xf32>
    %c1_42 = arith.constant 1 : index
    %c0_43 = arith.constant 0 : index
    %c0_44 = arith.constant 0 : index
    %71 = vector.load %arg8[%c1_42, %c0_43, %c0_44] : memref<6x1x128xf32, #tpu.memory_space<vmem>>, vector<1x1x128xf32>
    %72 = vector.shape_cast %71 : vector<1x1x128xf32> to vector<1x128xf32>
    %73 = vector.broadcast %72 : vector<1x128xf32> to vector<8x128xf32>
    %74 = arith.addf %70, %73 : vector<8x128xf32>
    %75 = arith.addf %74, %54 : vector<8x128xf32>
    %c1_45 = arith.constant 1 : index
    %c0_46 = arith.constant 0 : index
    %c0_47 = arith.constant 0 : index
    %76 = vector.load %arg9[%c1_45, %c0_46, %c0_47] : memref<6x1x128xf32, #tpu.memory_space<vmem>>, vector<1x1x128xf32>
    %77 = vector.shape_cast %76 : vector<1x1x128xf32> to vector<1x128xf32>
    %c1_48 = arith.constant 1 : index
    %c0_49 = arith.constant 0 : index
    %c0_50 = arith.constant 0 : index
    %78 = vector.load %arg10[%c1_48, %c0_49, %c0_50] : memref<6x1x128xf32, #tpu.memory_space<vmem>>, vector<1x1x128xf32>
    %79 = vector.shape_cast %78 : vector<1x1x128xf32> to vector<1x128xf32>
    %cst_51 = arith.constant dense<0.000000e+00> : vector<8xf32>
    %80 = vector.multi_reduction <add>, %75, %cst_51 [1] : vector<8x128xf32> to vector<8xf32>
    %81 = vector.shape_cast %80 : vector<8xf32> to vector<8x1xf32>
    %cst_52 = arith.constant 3.200000e+01 : f32
    %82 = vector.broadcast %cst_52 : f32 to vector<8x1xf32>
    %83 = arith.divf %81, %82 : vector<8x1xf32>
    %84 = arith.mulf %75, %75 : vector<8x128xf32>
    %cst_53 = arith.constant dense<0.000000e+00> : vector<8xf32>
    %85 = vector.multi_reduction <add>, %84, %cst_53 [1] : vector<8x128xf32> to vector<8xf32>
    %86 = vector.shape_cast %85 : vector<8xf32> to vector<8x1xf32>
    %cst_54 = arith.constant 3.200000e+01 : f32
    %87 = vector.broadcast %cst_54 : f32 to vector<8x1xf32>
    %88 = arith.divf %86, %87 : vector<8x1xf32>
    %89 = arith.mulf %83, %83 : vector<8x1xf32>
    %90 = arith.subf %88, %89 : vector<8x1xf32>
    %91 = vector.broadcast %83 : vector<8x1xf32> to vector<8x128xf32>
    %92 = arith.subf %75, %91 : vector<8x128xf32>
    %cst_55 = arith.constant 9.99999974E-6 : f32
    %93 = vector.broadcast %cst_55 : f32 to vector<8x1xf32>
    %94 = arith.addf %90, %93 : vector<8x1xf32>
    %95 = math.rsqrt %94 : vector<8x1xf32>
    %96 = vector.broadcast %95 : vector<8x1xf32> to vector<8x128xf32>
    %97 = arith.mulf %92, %96 : vector<8x128xf32>
    %98 = vector.broadcast %77 : vector<1x128xf32> to vector<8x128xf32>
    %99 = arith.mulf %97, %98 : vector<8x128xf32>
    %100 = vector.broadcast %79 : vector<1x128xf32> to vector<8x128xf32>
    %101 = arith.addf %99, %100 : vector<8x128xf32>
    %c2 = arith.constant 2 : index
    %c0_56 = arith.constant 0 : index
    %c0_57 = arith.constant 0 : index
    %102 = vector.load %arg5[%c2, %c0_56, %c0_57] : memref<6x128x128xf32, #tpu.memory_space<vmem>>, vector<1x128x128xf32>
    %103 = vector.shape_cast %102 : vector<1x128x128xf32> to vector<128x128xf32>
    %104 = arith.truncf %101 : vector<8x128xf32> to vector<8x128xbf16>
    %105 = arith.truncf %103 : vector<128x128xf32> to vector<128x128xbf16>
    %cst_58 = arith.constant dense<0.000000e+00> : vector<8x128xf32>
    %106 = tpu.matmul %104, %105, %cst_58 {dimension_numbers = #tpu.dot_dimension_numbers<[1], [0], [0], [1], [0, 0, 1, 1], [], []>} : vector<8x128xbf16>, vector<128x128xbf16>, vector<8x128xf32> -> vector<8x128xf32>
    %c2_59 = arith.constant 2 : index
    %c0_60 = arith.constant 0 : index
    %c0_61 = arith.constant 0 : index
    %107 = vector.load %arg6[%c2_59, %c0_60, %c0_61] : memref<6x1x128xf32, #tpu.memory_space<vmem>>, vector<1x1x128xf32>
    %108 = vector.shape_cast %107 : vector<1x1x128xf32> to vector<1x128xf32>
    %109 = vector.broadcast %108 : vector<1x128xf32> to vector<8x128xf32>
    %110 = arith.addf %106, %109 : vector<8x128xf32>
    %cst_62 = arith.constant 0.000000e+00 : f32
    %111 = vector.broadcast %cst_62 : f32 to vector<8x128xf32>
    %112 = arith.maximumf %110, %111 : vector<8x128xf32>
    %c2_63 = arith.constant 2 : index
    %c0_64 = arith.constant 0 : index
    %c0_65 = arith.constant 0 : index
    %113 = vector.load %arg7[%c2_63, %c0_64, %c0_65] : memref<6x128x128xf32, #tpu.memory_space<vmem>>, vector<1x128x128xf32>
    %114 = vector.shape_cast %113 : vector<1x128x128xf32> to vector<128x128xf32>
    %115 = arith.truncf %112 : vector<8x128xf32> to vector<8x128xbf16>
    %116 = arith.truncf %114 : vector<128x128xf32> to vector<128x128xbf16>
    %cst_66 = arith.constant dense<0.000000e+00> : vector<8x128xf32>
    %117 = tpu.matmul %115, %116, %cst_66 {dimension_numbers = #tpu.dot_dimension_numbers<[1], [0], [0], [1], [0, 0, 1, 1], [], []>} : vector<8x128xbf16>, vector<128x128xbf16>, vector<8x128xf32> -> vector<8x128xf32>
    %c2_67 = arith.constant 2 : index
    %c0_68 = arith.constant 0 : index
    %c0_69 = arith.constant 0 : index
    %118 = vector.load %arg8[%c2_67, %c0_68, %c0_69] : memref<6x1x128xf32, #tpu.memory_space<vmem>>, vector<1x1x128xf32>
    %119 = vector.shape_cast %118 : vector<1x1x128xf32> to vector<1x128xf32>
    %120 = vector.broadcast %119 : vector<1x128xf32> to vector<8x128xf32>
    %121 = arith.addf %117, %120 : vector<8x128xf32>
    %122 = arith.addf %121, %101 : vector<8x128xf32>
    %c2_70 = arith.constant 2 : index
    %c0_71 = arith.constant 0 : index
    %c0_72 = arith.constant 0 : index
    %123 = vector.load %arg9[%c2_70, %c0_71, %c0_72] : memref<6x1x128xf32, #tpu.memory_space<vmem>>, vector<1x1x128xf32>
    %124 = vector.shape_cast %123 : vector<1x1x128xf32> to vector<1x128xf32>
    %c2_73 = arith.constant 2 : index
    %c0_74 = arith.constant 0 : index
    %c0_75 = arith.constant 0 : index
    %125 = vector.load %arg10[%c2_73, %c0_74, %c0_75] : memref<6x1x128xf32, #tpu.memory_space<vmem>>, vector<1x1x128xf32>
    %126 = vector.shape_cast %125 : vector<1x1x128xf32> to vector<1x128xf32>
    %cst_76 = arith.constant dense<0.000000e+00> : vector<8xf32>
    %127 = vector.multi_reduction <add>, %122, %cst_76 [1] : vector<8x128xf32> to vector<8xf32>
    %128 = vector.shape_cast %127 : vector<8xf32> to vector<8x1xf32>
    %cst_77 = arith.constant 3.200000e+01 : f32
    %129 = vector.broadcast %cst_77 : f32 to vector<8x1xf32>
    %130 = arith.divf %128, %129 : vector<8x1xf32>
    %131 = arith.mulf %122, %122 : vector<8x128xf32>
    %cst_78 = arith.constant dense<0.000000e+00> : vector<8xf32>
    %132 = vector.multi_reduction <add>, %131, %cst_78 [1] : vector<8x128xf32> to vector<8xf32>
    %133 = vector.shape_cast %132 : vector<8xf32> to vector<8x1xf32>
    %cst_79 = arith.constant 3.200000e+01 : f32
    %134 = vector.broadcast %cst_79 : f32 to vector<8x1xf32>
    %135 = arith.divf %133, %134 : vector<8x1xf32>
    %136 = arith.mulf %130, %130 : vector<8x1xf32>
    %137 = arith.subf %135, %136 : vector<8x1xf32>
    %138 = vector.broadcast %130 : vector<8x1xf32> to vector<8x128xf32>
    %139 = arith.subf %122, %138 : vector<8x128xf32>
    %cst_80 = arith.constant 9.99999974E-6 : f32
    %140 = vector.broadcast %cst_80 : f32 to vector<8x1xf32>
    %141 = arith.addf %137, %140 : vector<8x1xf32>
    %142 = math.rsqrt %141 : vector<8x1xf32>
    %143 = vector.broadcast %142 : vector<8x1xf32> to vector<8x128xf32>
    %144 = arith.mulf %139, %143 : vector<8x128xf32>
    %145 = vector.broadcast %124 : vector<1x128xf32> to vector<8x128xf32>
    %146 = arith.mulf %144, %145 : vector<8x128xf32>
    %147 = vector.broadcast %126 : vector<1x128xf32> to vector<8x128xf32>
    %148 = arith.addf %146, %147 : vector<8x128xf32>
    %c3 = arith.constant 3 : index
    %c0_81 = arith.constant 0 : index
    %c0_82 = arith.constant 0 : index
    %149 = vector.load %arg5[%c3, %c0_81, %c0_82] : memref<6x128x128xf32, #tpu.memory_space<vmem>>, vector<1x128x128xf32>
    %150 = vector.shape_cast %149 : vector<1x128x128xf32> to vector<128x128xf32>
    %151 = arith.truncf %148 : vector<8x128xf32> to vector<8x128xbf16>
    %152 = arith.truncf %150 : vector<128x128xf32> to vector<128x128xbf16>
    %cst_83 = arith.constant dense<0.000000e+00> : vector<8x128xf32>
    %153 = tpu.matmul %151, %152, %cst_83 {dimension_numbers = #tpu.dot_dimension_numbers<[1], [0], [0], [1], [0, 0, 1, 1], [], []>} : vector<8x128xbf16>, vector<128x128xbf16>, vector<8x128xf32> -> vector<8x128xf32>
    %c3_84 = arith.constant 3 : index
    %c0_85 = arith.constant 0 : index
    %c0_86 = arith.constant 0 : index
    %154 = vector.load %arg6[%c3_84, %c0_85, %c0_86] : memref<6x1x128xf32, #tpu.memory_space<vmem>>, vector<1x1x128xf32>
    %155 = vector.shape_cast %154 : vector<1x1x128xf32> to vector<1x128xf32>
    %156 = vector.broadcast %155 : vector<1x128xf32> to vector<8x128xf32>
    %157 = arith.addf %153, %156 : vector<8x128xf32>
    %cst_87 = arith.constant 0.000000e+00 : f32
    %158 = vector.broadcast %cst_87 : f32 to vector<8x128xf32>
    %159 = arith.maximumf %157, %158 : vector<8x128xf32>
    %c3_88 = arith.constant 3 : index
    %c0_89 = arith.constant 0 : index
    %c0_90 = arith.constant 0 : index
    %160 = vector.load %arg7[%c3_88, %c0_89, %c0_90] : memref<6x128x128xf32, #tpu.memory_space<vmem>>, vector<1x128x128xf32>
    %161 = vector.shape_cast %160 : vector<1x128x128xf32> to vector<128x128xf32>
    %162 = arith.truncf %159 : vector<8x128xf32> to vector<8x128xbf16>
    %163 = arith.truncf %161 : vector<128x128xf32> to vector<128x128xbf16>
    %cst_91 = arith.constant dense<0.000000e+00> : vector<8x128xf32>
    %164 = tpu.matmul %162, %163, %cst_91 {dimension_numbers = #tpu.dot_dimension_numbers<[1], [0], [0], [1], [0, 0, 1, 1], [], []>} : vector<8x128xbf16>, vector<128x128xbf16>, vector<8x128xf32> -> vector<8x128xf32>
    %c3_92 = arith.constant 3 : index
    %c0_93 = arith.constant 0 : index
    %c0_94 = arith.constant 0 : index
    %165 = vector.load %arg8[%c3_92, %c0_93, %c0_94] : memref<6x1x128xf32, #tpu.memory_space<vmem>>, vector<1x1x128xf32>
    %166 = vector.shape_cast %165 : vector<1x1x128xf32> to vector<1x128xf32>
    %167 = vector.broadcast %166 : vector<1x128xf32> to vector<8x128xf32>
    %168 = arith.addf %164, %167 : vector<8x128xf32>
    %169 = arith.addf %168, %148 : vector<8x128xf32>
    %c3_95 = arith.constant 3 : index
    %c0_96 = arith.constant 0 : index
    %c0_97 = arith.constant 0 : index
    %170 = vector.load %arg9[%c3_95, %c0_96, %c0_97] : memref<6x1x128xf32, #tpu.memory_space<vmem>>, vector<1x1x128xf32>
    %171 = vector.shape_cast %170 : vector<1x1x128xf32> to vector<1x128xf32>
    %c3_98 = arith.constant 3 : index
    %c0_99 = arith.constant 0 : index
    %c0_100 = arith.constant 0 : index
    %172 = vector.load %arg10[%c3_98, %c0_99, %c0_100] : memref<6x1x128xf32, #tpu.memory_space<vmem>>, vector<1x1x128xf32>
    %173 = vector.shape_cast %172 : vector<1x1x128xf32> to vector<1x128xf32>
    %cst_101 = arith.constant dense<0.000000e+00> : vector<8xf32>
    %174 = vector.multi_reduction <add>, %169, %cst_101 [1] : vector<8x128xf32> to vector<8xf32>
    %175 = vector.shape_cast %174 : vector<8xf32> to vector<8x1xf32>
    %cst_102 = arith.constant 3.200000e+01 : f32
    %176 = vector.broadcast %cst_102 : f32 to vector<8x1xf32>
    %177 = arith.divf %175, %176 : vector<8x1xf32>
    %178 = arith.mulf %169, %169 : vector<8x128xf32>
    %cst_103 = arith.constant dense<0.000000e+00> : vector<8xf32>
    %179 = vector.multi_reduction <add>, %178, %cst_103 [1] : vector<8x128xf32> to vector<8xf32>
    %180 = vector.shape_cast %179 : vector<8xf32> to vector<8x1xf32>
    %cst_104 = arith.constant 3.200000e+01 : f32
    %181 = vector.broadcast %cst_104 : f32 to vector<8x1xf32>
    %182 = arith.divf %180, %181 : vector<8x1xf32>
    %183 = arith.mulf %177, %177 : vector<8x1xf32>
    %184 = arith.subf %182, %183 : vector<8x1xf32>
    %185 = vector.broadcast %177 : vector<8x1xf32> to vector<8x128xf32>
    %186 = arith.subf %169, %185 : vector<8x128xf32>
    %cst_105 = arith.constant 9.99999974E-6 : f32
    %187 = vector.broadcast %cst_105 : f32 to vector<8x1xf32>
    %188 = arith.addf %184, %187 : vector<8x1xf32>
    %189 = math.rsqrt %188 : vector<8x1xf32>
    %190 = vector.broadcast %189 : vector<8x1xf32> to vector<8x128xf32>
    %191 = arith.mulf %186, %190 : vector<8x128xf32>
    %192 = vector.broadcast %171 : vector<1x128xf32> to vector<8x128xf32>
    %193 = arith.mulf %191, %192 : vector<8x128xf32>
    %194 = vector.broadcast %173 : vector<1x128xf32> to vector<8x128xf32>
    %195 = arith.addf %193, %194 : vector<8x128xf32>
    %c4 = arith.constant 4 : index
    %c0_106 = arith.constant 0 : index
    %c0_107 = arith.constant 0 : index
    %196 = vector.load %arg5[%c4, %c0_106, %c0_107] : memref<6x128x128xf32, #tpu.memory_space<vmem>>, vector<1x128x128xf32>
    %197 = vector.shape_cast %196 : vector<1x128x128xf32> to vector<128x128xf32>
    %198 = arith.truncf %195 : vector<8x128xf32> to vector<8x128xbf16>
    %199 = arith.truncf %197 : vector<128x128xf32> to vector<128x128xbf16>
    %cst_108 = arith.constant dense<0.000000e+00> : vector<8x128xf32>
    %200 = tpu.matmul %198, %199, %cst_108 {dimension_numbers = #tpu.dot_dimension_numbers<[1], [0], [0], [1], [0, 0, 1, 1], [], []>} : vector<8x128xbf16>, vector<128x128xbf16>, vector<8x128xf32> -> vector<8x128xf32>
    %c4_109 = arith.constant 4 : index
    %c0_110 = arith.constant 0 : index
    %c0_111 = arith.constant 0 : index
    %201 = vector.load %arg6[%c4_109, %c0_110, %c0_111] : memref<6x1x128xf32, #tpu.memory_space<vmem>>, vector<1x1x128xf32>
    %202 = vector.shape_cast %201 : vector<1x1x128xf32> to vector<1x128xf32>
    %203 = vector.broadcast %202 : vector<1x128xf32> to vector<8x128xf32>
    %204 = arith.addf %200, %203 : vector<8x128xf32>
    %cst_112 = arith.constant 0.000000e+00 : f32
    %205 = vector.broadcast %cst_112 : f32 to vector<8x128xf32>
    %206 = arith.maximumf %204, %205 : vector<8x128xf32>
    %c4_113 = arith.constant 4 : index
    %c0_114 = arith.constant 0 : index
    %c0_115 = arith.constant 0 : index
    %207 = vector.load %arg7[%c4_113, %c0_114, %c0_115] : memref<6x128x128xf32, #tpu.memory_space<vmem>>, vector<1x128x128xf32>
    %208 = vector.shape_cast %207 : vector<1x128x128xf32> to vector<128x128xf32>
    %209 = arith.truncf %206 : vector<8x128xf32> to vector<8x128xbf16>
    %210 = arith.truncf %208 : vector<128x128xf32> to vector<128x128xbf16>
    %cst_116 = arith.constant dense<0.000000e+00> : vector<8x128xf32>
    %211 = tpu.matmul %209, %210, %cst_116 {dimension_numbers = #tpu.dot_dimension_numbers<[1], [0], [0], [1], [0, 0, 1, 1], [], []>} : vector<8x128xbf16>, vector<128x128xbf16>, vector<8x128xf32> -> vector<8x128xf32>
    %c4_117 = arith.constant 4 : index
    %c0_118 = arith.constant 0 : index
    %c0_119 = arith.constant 0 : index
    %212 = vector.load %arg8[%c4_117, %c0_118, %c0_119] : memref<6x1x128xf32, #tpu.memory_space<vmem>>, vector<1x1x128xf32>
    %213 = vector.shape_cast %212 : vector<1x1x128xf32> to vector<1x128xf32>
    %214 = vector.broadcast %213 : vector<1x128xf32> to vector<8x128xf32>
    %215 = arith.addf %211, %214 : vector<8x128xf32>
    %216 = arith.addf %215, %195 : vector<8x128xf32>
    %c4_120 = arith.constant 4 : index
    %c0_121 = arith.constant 0 : index
    %c0_122 = arith.constant 0 : index
    %217 = vector.load %arg9[%c4_120, %c0_121, %c0_122] : memref<6x1x128xf32, #tpu.memory_space<vmem>>, vector<1x1x128xf32>
    %218 = vector.shape_cast %217 : vector<1x1x128xf32> to vector<1x128xf32>
    %c4_123 = arith.constant 4 : index
    %c0_124 = arith.constant 0 : index
    %c0_125 = arith.constant 0 : index
    %219 = vector.load %arg10[%c4_123, %c0_124, %c0_125] : memref<6x1x128xf32, #tpu.memory_space<vmem>>, vector<1x1x128xf32>
    %220 = vector.shape_cast %219 : vector<1x1x128xf32> to vector<1x128xf32>
    %cst_126 = arith.constant dense<0.000000e+00> : vector<8xf32>
    %221 = vector.multi_reduction <add>, %216, %cst_126 [1] : vector<8x128xf32> to vector<8xf32>
    %222 = vector.shape_cast %221 : vector<8xf32> to vector<8x1xf32>
    %cst_127 = arith.constant 3.200000e+01 : f32
    %223 = vector.broadcast %cst_127 : f32 to vector<8x1xf32>
    %224 = arith.divf %222, %223 : vector<8x1xf32>
    %225 = arith.mulf %216, %216 : vector<8x128xf32>
    %cst_128 = arith.constant dense<0.000000e+00> : vector<8xf32>
    %226 = vector.multi_reduction <add>, %225, %cst_128 [1] : vector<8x128xf32> to vector<8xf32>
    %227 = vector.shape_cast %226 : vector<8xf32> to vector<8x1xf32>
    %cst_129 = arith.constant 3.200000e+01 : f32
    %228 = vector.broadcast %cst_129 : f32 to vector<8x1xf32>
    %229 = arith.divf %227, %228 : vector<8x1xf32>
    %230 = arith.mulf %224, %224 : vector<8x1xf32>
    %231 = arith.subf %229, %230 : vector<8x1xf32>
    %232 = vector.broadcast %224 : vector<8x1xf32> to vector<8x128xf32>
    %233 = arith.subf %216, %232 : vector<8x128xf32>
    %cst_130 = arith.constant 9.99999974E-6 : f32
    %234 = vector.broadcast %cst_130 : f32 to vector<8x1xf32>
    %235 = arith.addf %231, %234 : vector<8x1xf32>
    %236 = math.rsqrt %235 : vector<8x1xf32>
    %237 = vector.broadcast %236 : vector<8x1xf32> to vector<8x128xf32>
    %238 = arith.mulf %233, %237 : vector<8x128xf32>
    %239 = vector.broadcast %218 : vector<1x128xf32> to vector<8x128xf32>
    %240 = arith.mulf %238, %239 : vector<8x128xf32>
    %241 = vector.broadcast %220 : vector<1x128xf32> to vector<8x128xf32>
    %242 = arith.addf %240, %241 : vector<8x128xf32>
    %c5 = arith.constant 5 : index
    %c0_131 = arith.constant 0 : index
    %c0_132 = arith.constant 0 : index
    %243 = vector.load %arg5[%c5, %c0_131, %c0_132] : memref<6x128x128xf32, #tpu.memory_space<vmem>>, vector<1x128x128xf32>
    %244 = vector.shape_cast %243 : vector<1x128x128xf32> to vector<128x128xf32>
    %245 = arith.truncf %242 : vector<8x128xf32> to vector<8x128xbf16>
    %246 = arith.truncf %244 : vector<128x128xf32> to vector<128x128xbf16>
    %cst_133 = arith.constant dense<0.000000e+00> : vector<8x128xf32>
    %247 = tpu.matmul %245, %246, %cst_133 {dimension_numbers = #tpu.dot_dimension_numbers<[1], [0], [0], [1], [0, 0, 1, 1], [], []>} : vector<8x128xbf16>, vector<128x128xbf16>, vector<8x128xf32> -> vector<8x128xf32>
    %c5_134 = arith.constant 5 : index
    %c0_135 = arith.constant 0 : index
    %c0_136 = arith.constant 0 : index
    %248 = vector.load %arg6[%c5_134, %c0_135, %c0_136] : memref<6x1x128xf32, #tpu.memory_space<vmem>>, vector<1x1x128xf32>
    %249 = vector.shape_cast %248 : vector<1x1x128xf32> to vector<1x128xf32>
    %250 = vector.broadcast %249 : vector<1x128xf32> to vector<8x128xf32>
    %251 = arith.addf %247, %250 : vector<8x128xf32>
    %cst_137 = arith.constant 0.000000e+00 : f32
    %252 = vector.broadcast %cst_137 : f32 to vector<8x128xf32>
    %253 = arith.maximumf %251, %252 : vector<8x128xf32>
    %c5_138 = arith.constant 5 : index
    %c0_139 = arith.constant 0 : index
    %c0_140 = arith.constant 0 : index
    %254 = vector.load %arg7[%c5_138, %c0_139, %c0_140] : memref<6x128x128xf32, #tpu.memory_space<vmem>>, vector<1x128x128xf32>
    %255 = vector.shape_cast %254 : vector<1x128x128xf32> to vector<128x128xf32>
    %256 = arith.truncf %253 : vector<8x128xf32> to vector<8x128xbf16>
    %257 = arith.truncf %255 : vector<128x128xf32> to vector<128x128xbf16>
    %cst_141 = arith.constant dense<0.000000e+00> : vector<8x128xf32>
    %258 = tpu.matmul %256, %257, %cst_141 {dimension_numbers = #tpu.dot_dimension_numbers<[1], [0], [0], [1], [0, 0, 1, 1], [], []>} : vector<8x128xbf16>, vector<128x128xbf16>, vector<8x128xf32> -> vector<8x128xf32>
    %c5_142 = arith.constant 5 : index
    %c0_143 = arith.constant 0 : index
    %c0_144 = arith.constant 0 : index
    %259 = vector.load %arg8[%c5_142, %c0_143, %c0_144] : memref<6x1x128xf32, #tpu.memory_space<vmem>>, vector<1x1x128xf32>
    %260 = vector.shape_cast %259 : vector<1x1x128xf32> to vector<1x128xf32>
    %261 = vector.broadcast %260 : vector<1x128xf32> to vector<8x128xf32>
    %262 = arith.addf %258, %261 : vector<8x128xf32>
    %263 = arith.addf %262, %242 : vector<8x128xf32>
    %c5_145 = arith.constant 5 : index
    %c0_146 = arith.constant 0 : index
    %c0_147 = arith.constant 0 : index
    %264 = vector.load %arg9[%c5_145, %c0_146, %c0_147] : memref<6x1x128xf32, #tpu.memory_space<vmem>>, vector<1x1x128xf32>
    %265 = vector.shape_cast %264 : vector<1x1x128xf32> to vector<1x128xf32>
    %c5_148 = arith.constant 5 : index
    %c0_149 = arith.constant 0 : index
    %c0_150 = arith.constant 0 : index
    %266 = vector.load %arg10[%c5_148, %c0_149, %c0_150] : memref<6x1x128xf32, #tpu.memory_space<vmem>>, vector<1x1x128xf32>
    %267 = vector.shape_cast %266 : vector<1x1x128xf32> to vector<1x128xf32>
    %cst_151 = arith.constant dense<0.000000e+00> : vector<8xf32>
    %268 = vector.multi_reduction <add>, %263, %cst_151 [1] : vector<8x128xf32> to vector<8xf32>
    %269 = vector.shape_cast %268 : vector<8xf32> to vector<8x1xf32>
    %cst_152 = arith.constant 3.200000e+01 : f32
    %270 = vector.broadcast %cst_152 : f32 to vector<8x1xf32>
    %271 = arith.divf %269, %270 : vector<8x1xf32>
    %272 = arith.mulf %263, %263 : vector<8x128xf32>
    %cst_153 = arith.constant dense<0.000000e+00> : vector<8xf32>
    %273 = vector.multi_reduction <add>, %272, %cst_153 [1] : vector<8x128xf32> to vector<8xf32>
    %274 = vector.shape_cast %273 : vector<8xf32> to vector<8x1xf32>
    %cst_154 = arith.constant 3.200000e+01 : f32
    %275 = vector.broadcast %cst_154 : f32 to vector<8x1xf32>
    %276 = arith.divf %274, %275 : vector<8x1xf32>
    %277 = arith.mulf %271, %271 : vector<8x1xf32>
    %278 = arith.subf %276, %277 : vector<8x1xf32>
    %279 = vector.broadcast %271 : vector<8x1xf32> to vector<8x128xf32>
    %280 = arith.subf %263, %279 : vector<8x128xf32>
    %cst_155 = arith.constant 9.99999974E-6 : f32
    %281 = vector.broadcast %cst_155 : f32 to vector<8x1xf32>
    %282 = arith.addf %278, %281 : vector<8x1xf32>
    %283 = math.rsqrt %282 : vector<8x1xf32>
    %284 = vector.broadcast %283 : vector<8x1xf32> to vector<8x128xf32>
    %285 = arith.mulf %280, %284 : vector<8x128xf32>
    %286 = vector.broadcast %265 : vector<1x128xf32> to vector<8x128xf32>
    %287 = arith.mulf %285, %286 : vector<8x128xf32>
    %288 = vector.broadcast %267 : vector<1x128xf32> to vector<8x128xf32>
    %289 = arith.addf %287, %288 : vector<8x128xf32>
    %c0_156 = arith.constant 0 : index
    %c0_157 = arith.constant 0 : index
    %290 = vector.load %arg15[%c0_156, %c0_157] : memref<128x128xf32, #tpu.memory_space<vmem>>, vector<128x128xf32>
    %291 = arith.truncf %289 : vector<8x128xf32> to vector<8x128xbf16>
    %292 = arith.truncf %290 : vector<128x128xf32> to vector<128x128xbf16>
    %cst_158 = arith.constant dense<0.000000e+00> : vector<8x128xf32>
    %293 = tpu.matmul %291, %292, %cst_158 {dimension_numbers = #tpu.dot_dimension_numbers<[1], [0], [0], [1], [0, 0, 1, 1], [], []>} : vector<8x128xbf16>, vector<128x128xbf16>, vector<8x128xf32> -> vector<8x128xf32>
    %c0_159 = arith.constant 0 : index
    %c0_160 = arith.constant 0 : index
    %294 = vector.load %arg16[%c0_159, %c0_160] : memref<1x128xf32, #tpu.memory_space<vmem>>, vector<1x128xf32>
    %295 = vector.broadcast %294 : vector<1x128xf32> to vector<8x128xf32>
    %296 = arith.addf %293, %295 : vector<8x128xf32>
    %c0_161 = arith.constant 0 : index
    %c0_162 = arith.constant 0 : index
    %297 = vector.load %arg11[%c0_161, %c0_162] : memref<128x128xf32, #tpu.memory_space<vmem>>, vector<128x128xf32>
    %298 = arith.truncf %289 : vector<8x128xf32> to vector<8x128xbf16>
    %299 = arith.truncf %297 : vector<128x128xf32> to vector<128x128xbf16>
    %cst_163 = arith.constant dense<0.000000e+00> : vector<8x128xf32>
    %300 = tpu.matmul %298, %299, %cst_163 {dimension_numbers = #tpu.dot_dimension_numbers<[1], [0], [0], [1], [0, 0, 1, 1], [], []>} : vector<8x128xbf16>, vector<128x128xbf16>, vector<8x128xf32> -> vector<8x128xf32>
    %c0_164 = arith.constant 0 : index
    %c0_165 = arith.constant 0 : index
    %301 = vector.load %arg12[%c0_164, %c0_165] : memref<1x128xf32, #tpu.memory_space<vmem>>, vector<1x128xf32>
    %302 = vector.broadcast %301 : vector<1x128xf32> to vector<8x128xf32>
    %303 = arith.addf %300, %302 : vector<8x128xf32>
    %cst_166 = arith.constant 0.000000e+00 : f32
    %304 = vector.broadcast %cst_166 : f32 to vector<8x128xf32>
    %305 = arith.maximumf %303, %304 : vector<8x128xf32>
    %c0_167 = arith.constant 0 : index
    %c0_168 = arith.constant 0 : index
    %306 = vector.load %arg13[%c0_167, %c0_168] : memref<128x128xf32, #tpu.memory_space<vmem>>, vector<128x128xf32>
    %307 = arith.truncf %305 : vector<8x128xf32> to vector<8x128xbf16>
    %308 = arith.truncf %306 : vector<128x128xf32> to vector<128x128xbf16>
    %cst_169 = arith.constant dense<0.000000e+00> : vector<8x128xf32>
    %309 = tpu.matmul %307, %308, %cst_169 {dimension_numbers = #tpu.dot_dimension_numbers<[1], [0], [0], [1], [0, 0, 1, 1], [], []>} : vector<8x128xbf16>, vector<128x128xbf16>, vector<8x128xf32> -> vector<8x128xf32>
    %c0_170 = arith.constant 0 : index
    %c0_171 = arith.constant 0 : index
    %310 = vector.load %arg14[%c0_170, %c0_171] : memref<1x128xf32, #tpu.memory_space<vmem>>, vector<1x128xf32>
    %311 = vector.broadcast %310 : vector<1x128xf32> to vector<8x128xf32>
    %312 = arith.addf %309, %311 : vector<8x128xf32>
    %313 = arith.addf %312, %296 : vector<8x128xf32>
    %c0_172 = arith.constant 0 : index
    %c0_173 = arith.constant 0 : index
    %314 = vector.load %arg17[%c0_172, %c0_173] : memref<1x128xf32, #tpu.memory_space<vmem>>, vector<1x128xf32>
    %c0_174 = arith.constant 0 : index
    %c0_175 = arith.constant 0 : index
    %315 = vector.load %arg18[%c0_174, %c0_175] : memref<1x128xf32, #tpu.memory_space<vmem>>, vector<1x128xf32>
    %cst_176 = arith.constant dense<0.000000e+00> : vector<8xf32>
    %316 = vector.multi_reduction <add>, %313, %cst_176 [1] : vector<8x128xf32> to vector<8xf32>
    %317 = vector.shape_cast %316 : vector<8xf32> to vector<8x1xf32>
    %cst_177 = arith.constant 3.000000e+00 : f32
    %318 = vector.broadcast %cst_177 : f32 to vector<8x1xf32>
    %319 = arith.divf %317, %318 : vector<8x1xf32>
    %320 = arith.mulf %313, %313 : vector<8x128xf32>
    %cst_178 = arith.constant dense<0.000000e+00> : vector<8xf32>
    %321 = vector.multi_reduction <add>, %320, %cst_178 [1] : vector<8x128xf32> to vector<8xf32>
    %322 = vector.shape_cast %321 : vector<8xf32> to vector<8x1xf32>
    %cst_179 = arith.constant 3.000000e+00 : f32
    %323 = vector.broadcast %cst_179 : f32 to vector<8x1xf32>
    %324 = arith.divf %322, %323 : vector<8x1xf32>
    %325 = arith.mulf %319, %319 : vector<8x1xf32>
    %326 = arith.subf %324, %325 : vector<8x1xf32>
    %327 = vector.broadcast %319 : vector<8x1xf32> to vector<8x128xf32>
    %328 = arith.subf %313, %327 : vector<8x128xf32>
    %cst_180 = arith.constant 9.99999974E-6 : f32
    %329 = vector.broadcast %cst_180 : f32 to vector<8x1xf32>
    %330 = arith.addf %326, %329 : vector<8x1xf32>
    %331 = math.rsqrt %330 : vector<8x1xf32>
    %332 = vector.broadcast %331 : vector<8x1xf32> to vector<8x128xf32>
    %333 = arith.mulf %328, %332 : vector<8x128xf32>
    %334 = vector.broadcast %314 : vector<1x128xf32> to vector<8x128xf32>
    %335 = arith.mulf %333, %334 : vector<8x128xf32>
    %336 = vector.broadcast %315 : vector<1x128xf32> to vector<8x128xf32>
    %337 = arith.addf %335, %336 : vector<8x128xf32>
    %c0_181 = arith.constant 0 : index
    %c0_182 = arith.constant 0 : index
    %338 = vector.load %arg21[%c0_181, %c0_182] : memref<8x128xf32, #tpu.memory_space<vmem>>, vector<8x128xf32>
    tpu.vector_store %arg21[%c0_181, %c0_182], %337 {strides = array<i32>} : memref<8x128xf32, #tpu.memory_space<vmem>>, vector<8x128xf32>,
    %c0_183 = arith.constant 0 : index
    %c0_184 = arith.constant 0 : index
    %339 = vector.load %arg2[%c0_183, %c0_184] : memref<8x32xf32, #tpu.memory_space<vmem>>, vector<8x32xf32>
    %c0_185 = arith.constant 0 : index
    %c0_186 = arith.constant 0 : index
    %340 = vector.load %arg19[%c0_185, %c0_186] : memref<32x128xf32, #tpu.memory_space<vmem>>, vector<32x128xf32>
    %341 = arith.truncf %339 : vector<8x32xf32> to vector<8x32xbf16>
    %342 = arith.truncf %340 : vector<32x128xf32> to vector<32x128xbf16>
    %cst_187 = arith.constant dense<0.000000e+00> : vector<8x128xf32>
    %343 = tpu.matmul %341, %342, %cst_187 {dimension_numbers = #tpu.dot_dimension_numbers<[1], [0], [0], [1], [0, 0, 1, 1], [], []>} : vector<8x32xbf16>, vector<32x128xbf16>, vector<8x128xf32> -> vector<8x128xf32>
    %c0_188 = arith.constant 0 : index
    %c0_189 = arith.constant 0 : index
    %344 = vector.load %arg20[%c0_188, %c0_189] : memref<1x128xf32, #tpu.memory_space<vmem>>, vector<1x128xf32>
    %345 = vector.broadcast %344 : vector<1x128xf32> to vector<8x128xf32>
    %346 = arith.addf %343, %345 : vector<8x128xf32>
    %c0_190 = arith.constant 0 : index
    %c0_191 = arith.constant 0 : index
    %347 = vector.load %arg22[%c0_190, %c0_191] : memref<8x128xf32, #tpu.memory_space<vmem>>, vector<8x128xf32>
    tpu.vector_store %arg22[%c0_190, %c0_191], %346 {strides = array<i32>} : memref<8x128xf32, #tpu.memory_space<vmem>>, vector<8x128xf32>,
    return
  }
  func.func @transform_0(%arg0: i32) -> (i32, i32) {
    %c0_i32 = arith.constant 0 : i32
    %c0_i32_0 = arith.constant 0 : i32
    return %arg0, %c0_i32 : i32, i32
  }
  func.func @transform_1(%arg0: i32) -> (i32, i32) {
    %c0_i32 = arith.constant 0 : i32
    %c0_i32_0 = arith.constant 0 : i32
    return %arg0, %c0_i32 : i32, i32
  }
  func.func @transform_2(%arg0: i32) -> (i32, i32) {
    %c0_i32 = arith.constant 0 : i32
    %c0_i32_0 = arith.constant 0 : i32
    %c0_i32_1 = arith.constant 0 : i32
    return %c0_i32, %c0_i32_0 : i32, i32
  }
  func.func @transform_3(%arg0: i32) -> (i32, i32) {
    %c0_i32 = arith.constant 0 : i32
    %c0_i32_0 = arith.constant 0 : i32
    %c0_i32_1 = arith.constant 0 : i32
    return %c0_i32, %c0_i32_0 : i32, i32
  }
  func.func @transform_4(%arg0: i32) -> (i32, i32, i32) {
    %c0_i32 = arith.constant 0 : i32
    %c0_i32_0 = arith.constant 0 : i32
    %c0_i32_1 = arith.constant 0 : i32
    %c0_i32_2 = arith.constant 0 : i32
    return %c0_i32, %c0_i32_0, %c0_i32_1 : i32, i32, i32
  }
  func.func @transform_5(%arg0: i32) -> (i32, i32, i32) {
    %c0_i32 = arith.constant 0 : i32
    %c0_i32_0 = arith.constant 0 : i32
    %c0_i32_1 = arith.constant 0 : i32
    %c0_i32_2 = arith.constant 0 : i32
    return %c0_i32, %c0_i32_0, %c0_i32_1 : i32, i32, i32
  }
  func.func @transform_6(%arg0: i32) -> (i32, i32, i32) {
    %c0_i32 = arith.constant 0 : i32
    %c0_i32_0 = arith.constant 0 : i32
    %c0_i32_1 = arith.constant 0 : i32
    %c0_i32_2 = arith.constant 0 : i32
    return %c0_i32, %c0_i32_0, %c0_i32_1 : i32, i32, i32
  }
  func.func @transform_7(%arg0: i32) -> (i32, i32, i32) {
    %c0_i32 = arith.constant 0 : i32
    %c0_i32_0 = arith.constant 0 : i32
    %c0_i32_1 = arith.constant 0 : i32
    %c0_i32_2 = arith.constant 0 : i32
    return %c0_i32, %c0_i32_0, %c0_i32_1 : i32, i32, i32
  }
  func.func @transform_8(%arg0: i32) -> (i32, i32, i32) {
    %c0_i32 = arith.constant 0 : i32
    %c0_i32_0 = arith.constant 0 : i32
    %c0_i32_1 = arith.constant 0 : i32
    %c0_i32_2 = arith.constant 0 : i32
    return %c0_i32, %c0_i32_0, %c0_i32_1 : i32, i32, i32
  }
  func.func @transform_9(%arg0: i32) -> (i32, i32, i32) {
    %c0_i32 = arith.constant 0 : i32
    %c0_i32_0 = arith.constant 0 : i32
    %c0_i32_1 = arith.constant 0 : i32
    %c0_i32_2 = arith.constant 0 : i32
    return %c0_i32, %c0_i32_0, %c0_i32_1 : i32, i32, i32
  }
  func.func @transform_10(%arg0: i32) -> (i32, i32) {
    %c0_i32 = arith.constant 0 : i32
    %c0_i32_0 = arith.constant 0 : i32
    %c0_i32_1 = arith.constant 0 : i32
    return %c0_i32, %c0_i32_0 : i32, i32
  }
  func.func @transform_11(%arg0: i32) -> (i32, i32) {
    %c0_i32 = arith.constant 0 : i32
    %c0_i32_0 = arith.constant 0 : i32
    %c0_i32_1 = arith.constant 0 : i32
    return %c0_i32, %c0_i32_0 : i32, i32
  }
  func.func @transform_12(%arg0: i32) -> (i32, i32) {
    %c0_i32 = arith.constant 0 : i32
    %c0_i32_0 = arith.constant 0 : i32
    %c0_i32_1 = arith.constant 0 : i32
    return %c0_i32, %c0_i32_0 : i32, i32
  }
  func.func @transform_13(%arg0: i32) -> (i32, i32) {
    %c0_i32 = arith.constant 0 : i32
    %c0_i32_0 = arith.constant 0 : i32
    %c0_i32_1 = arith.constant 0 : i32
    return %c0_i32, %c0_i32_0 : i32, i32
  }
  func.func @transform_14(%arg0: i32) -> (i32, i32) {
    %c0_i32 = arith.constant 0 : i32
    %c0_i32_0 = arith.constant 0 : i32
    %c0_i32_1 = arith.constant 0 : i32
    return %c0_i32, %c0_i32_0 : i32, i32
  }
  func.func @transform_15(%arg0: i32) -> (i32, i32) {
    %c0_i32 = arith.constant 0 : i32
    %c0_i32_0 = arith.constant 0 : i32
    %c0_i32_1 = arith.constant 0 : i32
    return %c0_i32, %c0_i32_0 : i32, i32
  }
  func.func @transform_16(%arg0: i32) -> (i32, i32) {
    %c0_i32 = arith.constant 0 : i32
    %c0_i32_0 = arith.constant 0 : i32
    %c0_i32_1 = arith.constant 0 : i32
    return %c0_i32, %c0_i32_0 : i32, i32
  }
  func.func @transform_17(%arg0: i32) -> (i32, i32) {
    %c0_i32 = arith.constant 0 : i32
    %c0_i32_0 = arith.constant 0 : i32
    %c0_i32_1 = arith.constant 0 : i32
    return %c0_i32, %c0_i32_0 : i32, i32
  }
  func.func @transform_18(%arg0: i32) -> (i32, i32) {
    %c0_i32 = arith.constant 0 : i32
    %c0_i32_0 = arith.constant 0 : i32
    %c0_i32_1 = arith.constant 0 : i32
    return %c0_i32, %c0_i32_0 : i32, i32
  }
  func.func @transform_19(%arg0: i32) -> (i32, i32) {
    %c0_i32 = arith.constant 0 : i32
    %c0_i32_0 = arith.constant 0 : i32
    %c0_i32_1 = arith.constant 0 : i32
    return %c0_i32, %c0_i32_0 : i32, i32
  }
  func.func @transform_20(%arg0: i32) -> (i32, i32) {
    %c0_i32 = arith.constant 0 : i32
    %c0_i32_0 = arith.constant 0 : i32
    return %arg0, %c0_i32 : i32, i32
  }
  func.func @transform_21(%arg0: i32) -> (i32, i32) {
    %c0_i32 = arith.constant 0 : i32
    %c0_i32_0 = arith.constant 0 : i32
    return %arg0, %c0_i32 : i32, i32
  }
}

</mosaic_0001>

<bundles_post_ra>
// kernel: tide_forward.1
= control target key start
LH: loop header
LB: loop body
LE: loop exit
PB: predicated region body
PF: predicated region fallthrough
CT: control target
= control target key end

     0   :  { %v2213_v0 = vmov 0.0   ;;  %vm83_vm0 = vcmask 1041408   ;;  %vm2214_vm1 = vmmov 0   ;;  %vm79_vm2 = vcmask 31744   ;;  %s3358_s2 = inlined_call_operand.vmem [shape: f32[4,128], index: 2, kind: input, shape index: {}]   ;;  %s3359_s0 = inlined_call_operand.vmem [shape: f32[8,4], index: 0, kind: input, shape index: {}]   ;;  %s3360_s4 = inlined_call_operand.vmem [shape: f32[6,128,128], index: 4, kind: input, shape index: {}]   ;;  %s3361_s6 = inlined_call_operand.vmem [shape: f32[6,128,128], index: 6, kind: input, shape index: {}]   ;;  %s3362_s3 = inlined_call_operand.vmem [shape: f32[1,128], index: 3, kind: input, shape index: {}]   ;;  %s3363_s5 = inlined_call_operand.vmem [shape: f32[6,1,128], index: 5, kind: input, shape index: {}]   ;;  %s3364_s7 = inlined_call_operand.vmem [shape: f32[6,1,128], index: 7, kind: input, shape index: {}]   ;;  %s3365_s8 = inlined_call_operand.vmem [shape: f32[6,1,128], index: 8, kind: input, shape index: {}]   ;;  %s3366_s9 = inlined_call_operand.vmem [shape: f32[6,1,128], index: 9, kind: input, shape index: {}]   ;;  %s3367_s14 = inlined_call_operand.vmem [shape: f32[128,128], index: 14, kind: input, shape index: {}]   ;;  %s3368_s10 = inlined_call_operand.vmem [shape: f32[128,128], index: 10, kind: input, shape index: {}]   ;;  %s3369_s12 = inlined_call_operand.vmem [shape: f32[128,128], index: 12, kind: input, shape index: {}]   ;;  %s3370_s18 = inlined_call_operand.vmem [shape: f32[32,128], index: 18, kind: input, shape index: {}]   ;;  %s3371_s1 = inlined_call_operand.vmem [shape: f32[8,32], index: 1, kind: input, shape index: {}]   ;;  %s3372_s11 = inlined_call_operand.vmem [shape: f32[1,128], index: 11, kind: input, shape index: {}]   ;;  %s3373_s13 = inlined_call_operand.vmem [shape: f32[1,128], index: 13, kind: input, shape index: {}]   ;;  %s3374_s15 = inlined_call_operand.vmem [shape: f32[1,128], index: 15, kind: input, shape index: {}]   ;;  %s3375_s19 = inlined_call_operand.vmem [shape: f32[1,128], index: 19, kind: input, shape index: {}]   ;;  %s3376_s21 = inlined_call_operand.vmem [shape: f32[8,128], index: 21, kind: output, shape index: {1}]   ;;  %s3377_s16 = inlined_call_operand.vmem [shape: f32[1,128], index: 16, kind: input, shape index: {}]   ;;  %s3378_s17 = inlined_call_operand.vmem [shape: f32[1,128], index: 17, kind: input, shape index: {}]   ;;  %s3379_s20 = inlined_call_operand.vmem [shape: f32[8,128], index: 20, kind: output, shape index: {0}]  }
   0x1   :  { %3383 = sst [smem:[#allocation2_spill]] %s3358_s2  ;;  %1877 = vmatprep.subr.bf16.mxu0 %v2213_v0  ;;  %1879 = vmatprep.mubr.msk.bf16.mxu0 %vm2214_vm1, %v2213_v0  ;;  %vm1471_vm3 = vcmask 261120  }
   0x2   :  { %3384 = sst [smem:[#allocation3_spill]] %s3359_s0  ;;  %s3389_s26 = sld [smem:[#allocation2_spill]]  ;;  %1883 = vmatprep.subr.bf16.mxu1 %v2213_v0  ;;  %1899 = vmatprep.mubr.msk.bf16.mxu1 %vm2214_vm1, %v2213_v0 }
   0x3   :  { %3385 = sst [smem:[#allocation4_spill]] %s3360_s4  ;;  %s3390_s28 = sld [smem:[#allocation3_spill]] }
   0x4   :  { %3386 = sst [smem:[#allocation5_spill]] %s3361_s6 }
   0x5   :  { %3387 = sst [smem:[#allocation6_spill]] %s3362_s3  ;;  %s3391_s3 = sld [smem:[#allocation4_spill]] }
   0x6   :  { %3388 = sst [smem:[#allocation7_spill]] %s3363_s5  ;;  %s3392_s0 = sld [smem:[#allocation5_spill]] }
   0x7   :  { %s3393_s22 = sld [smem:[#allocation6_spill]]  ;;  %s3394_s30 = sld [smem:[#allocation7_spill]] }
   0x8   :  { %v69_v1 = vld [vmem:[%s3389_s26] sm:$0xf] }
   0x9   :  { %v68_v2 = vld [vmem:[%s3390_s28] sm:$0xff]  ;;  %v71_v4 = vpack.c.bf16 %v69_v1, %v69_v1 }
   0xa   :  { %v70_v10 = vpack.c.bf16 %v68_v2, %v68_v2 }
   0xb   :  { %v127_v3 = vld [vmem:[%s3391_s3] sm:$0xff]  ;;  %v128_v5 = vld [vmem:[%s3391_s3 + $0x8] sm:$0xff]  ;;  %v129_v6 = vld [vmem:[%s3391_s3 + $0x10] sm:$0xff]  ;;  %v85_v9 = vsel %vm83_vm0, %v71_v4, 0 }
   0xc   :  { %v130_v7 = vld [vmem:[%s3391_s3 + $0x18] sm:$0xff]  ;;  %v144_v8 = vpack.c.bf16 %v128_v5, %v127_v3  ;;  %1878 = vmatpush3.bf16.msra.mxu0 %v85_v9  ;;  %v131_v12 = vld [vmem:[%s3391_s3 + $0x20] sm:$0xff]  ;;  %v132_v13 = vld [vmem:[%s3391_s3 + $0x28] sm:$0xff] }
   0xd   :  { %v145_v11 = vpack.c.bf16 %v130_v7, %v129_v6  ;;  %1903 = vmatprep.subr.bf16.mxu0 %v2213_v0  ;;  %v146_v14 = vpack.c.bf16 %v132_v13, %v131_v12  ;;  %v133_v15 = vld [vmem:[%s3391_s3 + $0x30] sm:$0xff]  ;;  %v134_v16 = vld [vmem:[%s3391_s3 + $0x38] sm:$0xff]  ;;  %v135_v18 = vld [vmem:[%s3391_s3 + $0x40] sm:$0xff] }
   0xe   :  { %1884 = vmatpush3.bf16.msra.mxu1 %v144_v8  ;;  %v147_v17 = vpack.c.bf16 %v134_v16, %v133_v15  ;;  %v136_v19 = vld [vmem:[%s3391_s3 + $0x48] sm:$0xff]  ;;  %v137_v21 = vld [vmem:[%s3391_s3 + $0x50] sm:$0xff]  ;;  %v138_v22 = vld [vmem:[%s3391_s3 + $0x58] sm:$0xff] }
   0xf   :  { %1885 = vmatprep.subr.bf16.mxu1 %v2213_v0  ;;  %1880 = vmatmul.mubr.msk.bf16.vlgmr.msra.gmra.mrb[0].mxu0 %vm79_vm2, %v70_v10  ;;  %v148_v20 = vpack.c.bf16 %v136_v19, %v135_v18  ;;  %v149_v23 = vpack.c.bf16 %v138_v22, %v137_v21  ;;  %v139_v24 = vld [vmem:[%s3391_s3 + $0x60] sm:$0xff]  ;;  %v140_v25 = vld [vmem:[%s3391_s3 + $0x68] sm:$0xff]  ;;  %v141_v27 = vld [vmem:[%s3391_s3 + $0x70] sm:$0xff] }
  0x10   :  { %1919 = vmatprep.mubr.msk.bf16.mxu0 %vm2214_vm1, %v2213_v0  ;;  %v150_v26 = vpack.c.bf16 %v140_v25, %v139_v24  ;;  %v142_v28 = vld [vmem:[%s3391_s3 + $0x78] sm:$0xff]  ;;  %v200_v30 = vld [vmem:[%s3392_s0] sm:$0xff]  ;;  %v201_v31 = vld [vmem:[%s3392_s0 + $0x8] sm:$0xff] }
  0x11   :  { %v151_v29 = vpack.c.bf16 %v142_v28, %v141_v27  ;;  %v202_v32 = vld [vmem:[%s3392_s0 + $0x10] sm:$0xff]  ;;  %v217_v33 = vpack.c.bf16 %v201_v31, %v200_v30  ;;  %v203_v34 = vld [vmem:[%s3392_s0 + $0x18] sm:$0xff]  ;;  %v204_v36 = vld [vmem:[%s3392_s0 + $0x20] sm:$0xff] }
  0x12   :  { %1886 = vmatpush3.bf16.msra.mxu1 %v145_v11  ;;  %v218_v35 = vpack.c.bf16 %v203_v34, %v202_v32  ;;  %v205_v37 = vld [vmem:[%s3392_s0 + $0x28] sm:$0xff]  ;;  %v206_v39 = vld [vmem:[%s3392_s0 + $0x30] sm:$0xff]  ;;  %v207_v40 = vld [vmem:[%s3392_s0 + $0x38] sm:$0xff] }
  0x13   :  { %1887 = vmatprep.subr.bf16.mxu1 %v2213_v0  ;;  %1904 = vmatpush3.bf16.msra.mxu0 %v217_v33  ;;  %v219_v38 = vpack.c.bf16 %v205_v37, %v204_v36  ;;  %v220_v41 = vpack.c.bf16 %v207_v40, %v206_v39  ;;  %v208_v42 = vld [vmem:[%s3392_s0 + $0x40] sm:$0xff]  ;;  %v209_v43 = vld [vmem:[%s3392_s0 + $0x48] sm:$0xff]  ;;  %v210_v45 = vld [vmem:[%s3392_s0 + $0x50] sm:$0xff] }
  0x14   :  { %1905 = vmatprep.subr.bf16.mxu0 %v2213_v0  ;;  %v221_v44 = vpack.c.bf16 %v209_v43, %v208_v42  ;;  %v211_v46 = vld [vmem:[%s3392_s0 + $0x58] sm:$0xff]  ;;  %v1524_v48 = vld [vmem:[%s3393_s22] ss:$0 sm:$0xff]  ;;  %v213_v56 = vld [vmem:[%s3392_s0 + $0x68] sm:$0xff] }
  0x15   :  { %v222_v47 = vpack.c.bf16 %v211_v46, %v210_v45  ;;  %v212_v55 = vld [vmem:[%s3392_s0 + $0x60] sm:$0xff]  ;;  %v214_v58 = vld [vmem:[%s3392_s0 + $0x70] sm:$0xff]  ;;  %v215_v59 = vld [vmem:[%s3392_s0 + $0x78] sm:$0xff] }
  0x16   :  { %1888 = vmatpush3.bf16.msra.mxu1 %v146_v14  ;;  %v223_v57 = vpack.c.bf16 %v213_v56, %v212_v55  ;;  %v224_v60 = vpack.c.bf16 %v215_v59, %v214_v58  ;;  %v1526_v61 = vld [vmem:[%s3394_s30] ss:$0 sm:$0xff]  ;;  %v1531_v7 = vld [vmem:[%s3391_s3 + $0x88] sm:$0xff]  ;;  %v1533_v18 = vld [vmem:[%s3391_s3 + $0x98] sm:$0xff] }
  0x17   :  { %1889 = vmatprep.subr.bf16.mxu1 %v2213_v0  ;;  %1906 = vmatpush3.bf16.msra.mxu0 %v218_v35  ;;  %v1530_v6 = vld [vmem:[%s3391_s3 + $0x80] sm:$0xff]  ;;  %v1535_v21 = vld [vmem:[%s3391_s3 + $0xa8] sm:$0xff]  ;;  %v1537_v24 = vld [vmem:[%s3391_s3 + $0xb8] sm:$0xff] }
  0x18   :  { %1907 = vmatprep.subr.bf16.mxu0 %v2213_v0  ;;  %v321_v8 = vpack.c.bf16 %v1531_v7, %v1530_v6  ;;  %v1527_v9 = vld [vmem:[%s3364_s7] ss:$0 sm:$0xff]  ;;  %v1539_v27 = vld [vmem:[%s3391_s3 + $0xc8] sm:$0xff]  ;;  %v1541_v30 = vld [vmem:[%s3391_s3 + $0xd8] sm:$0xff] }
  0x19   :  { %v1542_v32 = vld [vmem:[%s3391_s3 + $0xe0] sm:$0xff]  ;;  %v1543_v33 = vld [vmem:[%s3391_s3 + $0xe8] sm:$0xff]  ;;  %v1544_v35 = vld [vmem:[%s3391_s3 + $0xf0] sm:$0xff] }
  0x1a   :  { %1890 = vmatpush3.bf16.msra.mxu1 %v147_v17  ;;  %v1532_v17 = vld [vmem:[%s3391_s3 + $0x90] sm:$0xff]  ;;  %v327_v34 = vpack.c.bf16 %v1543_v33, %v1542_v32  ;;  %v1545_v36 = vld [vmem:[%s3391_s3 + $0xf8] sm:$0xff]  ;;  %v1549_v39 = vld [vmem:[%s3392_s0 + $0x88] sm:$0xff] }
  0x1b   :  { %1891 = vmatprep.subr.bf16.mxu1 %v2213_v0  ;;  %1908 = vmatpush3.bf16.msra.mxu0 %v219_v38  ;;  %v322_v19 = vpack.c.bf16 %v1533_v18, %v1532_v17  ;;  %v328_v37 = vpack.c.bf16 %v1545_v36, %v1544_v35  ;;  %v1548_v38 = vld [vmem:[%s3392_s0 + $0x80] sm:$0xff]  ;;  %v1550_v40 = vld [vmem:[%s3392_s0 + $0x90] sm:$0xff]  ;;  %v1551_v42 = vld [vmem:[%s3392_s0 + $0x98] sm:$0xff] }
  0x1c   :  { %1909 = vmatprep.subr.bf16.mxu0 %v2213_v0  ;;  %v397_v43 = vpack.c.bf16 %v1551_v42, %v1550_v40  ;;  %v1553_v45 = vld [vmem:[%s3392_s0 + $0xa8] sm:$0xff]  ;;  %v1572_v33 = vld [vmem:[%s3391_s3 + $0x110] sm:$0xff]  ;;  %v1574_v36 = vld [vmem:[%s3391_s3 + $0x120] sm:$0xff] }
  0x1d   :  { %v1577_v40 = vld [vmem:[%s3391_s3 + $0x138] sm:$0xff]  ;;  %v1578_v42 = vld [vmem:[%s3391_s3 + $0x140] sm:$0xff] }
  0x1e   :  { %1892 = vmatpush3.bf16.msra.mxu1 %v148_v20  ;;  %v1534_v20 = vld [vmem:[%s3391_s3 + $0xa0] sm:$0xff] }
  0x1f   :  { %1893 = vmatprep.subr.bf16.mxu1 %v2213_v0  ;;  %1910 = vmatpush3.bf16.msra.mxu0 %v220_v41  ;;  %v323_v22 = vpack.c.bf16 %v1535_v21, %v1534_v20  ;;  %v396_v41 = vpack.c.bf16 %v1549_v39, %v1548_v38  ;;  %v1576_v39 = vld [vmem:[%s3391_s3 + $0x130] sm:$0xff] }
  0x20   :  { %1911 = vmatprep.subr.bf16.mxu0 %v2213_v0 }
  0x22   :  { %1894 = vmatpush3.bf16.msra.mxu1 %v149_v23  ;;  %v1536_v23 = vld [vmem:[%s3391_s3 + $0xb0] sm:$0xff] }
  0x23   :  { %1895 = vmatprep.subr.bf16.mxu1 %v2213_v0  ;;  %1912 = vmatpush3.bf16.msra.mxu0 %v221_v44  ;;  %v324_v25 = vpack.c.bf16 %v1537_v24, %v1536_v23  ;;  %v1552_v44 = vld [vmem:[%s3392_s0 + $0xa0] sm:$0xff]  ;;  %v1571_v23 = vld [vmem:[%s3391_s3 + $0x108] sm:$0xff] }
  0x24   :  { %1913 = vmatprep.subr.bf16.mxu0 %v2213_v0  ;;  %v398_v46 = vpack.c.bf16 %v1553_v45, %v1552_v44  ;;  %v1580_v45 = vld [vmem:[%s3391_s3 + $0x150] sm:$0xff] }
  0x26   :  { %1896 = vmatpush3.bf16.msra.mxu1 %v150_v26  ;;  %v1538_v26 = vld [vmem:[%s3391_s3 + $0xc0] sm:$0xff] }
  0x27   :  { %1897 = vmatprep.subr.bf16.mxu1 %v2213_v0  ;;  %1914 = vmatpush3.bf16.msra.mxu0 %v222_v47  ;;  %v325_v28 = vpack.c.bf16 %v1539_v27, %v1538_v26  ;;  %v1554_v47 = vld [vmem:[%s3392_s0 + $0xb0] sm:$0xff] }
  0x28   :  { %1915 = vmatprep.subr.bf16.mxu0 %v2213_v0 }
  0x2a   :  { %1898 = vmatpush3.bf16.msra.mxu1 %v151_v29  ;;  %v1540_v29 = vld [vmem:[%s3391_s3 + $0xd0] sm:$0xff] }
  0x2b   :  { %1923 = vmatprep.subr.bf16.mxu1 %v2213_v0  ;;  %1916 = vmatpush3.bf16.msra.mxu0 %v223_v57  ;;  %v326_v31 = vpack.c.bf16 %v1541_v30, %v1540_v29 }
  0x2c   :  { %1917 = vmatprep.subr.bf16.mxu0 %v2213_v0 }
  0x2f   :  { %1918 = vmatpush3.bf16.msra.mxu0 %v224_v60 }
  0x30   :  { %1943 = vmatprep.subr.bf16.mxu0 %v2213_v0 }
  0xe2   :  { %v121_v49 = vpop.f32.mrb[0].mxu0 }
  0xe3   :  { %v122_v50 = vadd.f32 %v1524_v48, %v121_v49  ;;  %v1881_v51 = vpop.f32.mrb[1].mxu0  ;;  %v1555_v48 = vld [vmem:[%s3392_s0 + $0xb8] sm:$0xff] }
  0xe4   :  { %v124_v52 = vpop.f32.mrb[2].mxu0  ;;  %v399_v49 = vpack.c.bf16 %v1555_v48, %v1554_v47  ;;  %v1557_v51 = vld [vmem:[%s3392_s0 + $0xc8] sm:$0xff]  ;;  %v1582_v48 = vld [vmem:[%s3391_s3 + $0x160] sm:$0xff] }
  0xe5   :  { %v143_v53 = vpack.c.bf16 %v122_v50, %v122_v50  ;;  %v1882_v54 = vpop.f32.mrb[3].mxu0 }
  0xe6   :  { %v1559_v54 = vld [vmem:[%s3392_s0 + $0xd8] sm:$0xff] }
  0xe7   :  { %1900 = vmatmul.mubr.bf16.vlgmr.msra.gmra.mrb[0].mxu1 %v143_v53  ;;  %v1558_v53 = vld [vmem:[%s3392_s0 + $0xd0] sm:$0xff] }
  0xe8   :  { %1939 = vmatprep.mubr.msk.bf16.mxu1 %vm2214_vm1, %v2213_v0  ;;  %1924 = vmatpush3.bf16.msra.mxu1 %v321_v8  ;;  %v401_v55 = vpack.c.bf16 %v1559_v54, %v1558_v53  ;;  %v1560_v8 = vld [vmem:[%s3392_s0 + $0xe0] sm:$0xff] }
  0xe9   :  { %1925 = vmatprep.subr.bf16.mxu1 %v2213_v0  ;;  %v1588_v54 = vld [vmem:[%s3392_s0 + $0x100] sm:$0xff] }
  0xec   :  { %1926 = vmatpush3.bf16.msra.mxu1 %v322_v19 }
  0xed   :  { %1927 = vmatprep.subr.bf16.mxu1 %v2213_v0 }
  0xf0   :  { %1928 = vmatpush3.bf16.msra.mxu1 %v323_v22  ;;  %v1570_v22 = vld [vmem:[%s3391_s3 + $0x100] sm:$0xff] }
  0xf1   :  { %1929 = vmatprep.subr.bf16.mxu1 %v2213_v0  ;;  %v502_v24 = vpack.c.bf16 %v1571_v23, %v1570_v22 }
  0xf4   :  { %1930 = vmatpush3.bf16.msra.mxu1 %v324_v25  ;;  %v1565_v25 = vld [vmem:[%s3364_s7 + $0x1] ss:$0 sm:$0xff] }
  0xf5   :  { %1931 = vmatprep.subr.bf16.mxu1 %v2213_v0 }
  0xf8   :  { %1932 = vmatpush3.bf16.msra.mxu1 %v325_v28 }
  0xf9   :  { %1933 = vmatprep.subr.bf16.mxu1 %v2213_v0 }
  0xfc   :  { %1934 = vmatpush3.bf16.msra.mxu1 %v326_v31 }
  0xfd   :  { %1935 = vmatprep.subr.bf16.mxu1 %v2213_v0 }
 0x100   :  { %1936 = vmatpush3.bf16.msra.mxu1 %v327_v34  ;;  %v1573_v34 = vld [vmem:[%s3391_s3 + $0x118] sm:$0xff] }
 0x101   :  { %1937 = vmatprep.subr.bf16.mxu1 %v2213_v0  ;;  %v503_v35 = vpack.c.bf16 %v1573_v34, %v1572_v33 }
 0x104   :  { %1938 = vmatpush3.bf16.msra.mxu1 %v328_v37  ;;  %v1575_v37 = vld [vmem:[%s3391_s3 + $0x128] sm:$0xff] }
 0x105   :  { %1963 = vmatprep.subr.bf16.mxu1 %v2213_v0  ;;  %v504_v38 = vpack.c.bf16 %v1575_v37, %v1574_v36 }
 0x1ba   :  { %v193_v62 = vpop.f32.mrb[0].mxu1 }
 0x1bb   :  { %v194_v63 = vadd.f32 %v1526_v61, %v193_v62  ;;  %v1901_v1 = vpop.f32.mrb[1].mxu1 }
 0x1bc   :  { %v196_v2 = vpop.f32.mrb[2].mxu1 }
 0x1bd   :  { %v199_v3 = vmax.f32 %v194_v63, 0.0  ;;  %v1902_v4 = vpop.f32.mrb[3].mxu1  ;;  %v1528_v2 = vld [vmem:[%s3365_s8] ss:$0 sm:$0xff] }
 0x1be   :  { %v1529_v4 = vld [vmem:[%s3366_s9] ss:$0 sm:$0xff] }
 0x1bf   :  { %v216_v5 = vpack.c.bf16 %v199_v3, %v199_v3 }
 0x1c1   :  { %1920 = vmatmul.mubr.bf16.vlgmr.msra.gmra.mrb[4].mxu0 %v216_v5 }
 0x1c2   :  { %1959 = vmatprep.mubr.msk.bf16.mxu0 %vm2214_vm1, %v2213_v0  ;;  %1944 = vmatpush3.bf16.msra.mxu0 %v396_v41  ;;  %v505_v41 = vpack.c.bf16 %v1577_v40, %v1576_v39  ;;  %v1611_v39 = vld [vmem:[%s3391_s3 + $0x188] sm:$0xff] }
 0x1c3   :  { %1945 = vmatprep.subr.bf16.mxu0 %v2213_v0 }
 0x1c6   :  { %1946 = vmatpush3.bf16.msra.mxu0 %v397_v43  ;;  %v1579_v43 = vld [vmem:[%s3391_s3 + $0x148] sm:$0xff] }
 0x1c7   :  { %1947 = vmatprep.subr.bf16.mxu0 %v2213_v0  ;;  %v506_v44 = vpack.c.bf16 %v1579_v43, %v1578_v42 }
 0x1ca   :  { %1948 = vmatpush3.bf16.msra.mxu0 %v398_v46  ;;  %v1581_v46 = vld [vmem:[%s3391_s3 + $0x158] sm:$0xff] }
 0x1cb   :  { %1949 = vmatprep.subr.bf16.mxu0 %v2213_v0  ;;  %v507_v47 = vpack.c.bf16 %v1581_v46, %v1580_v45 }
 0x1ce   :  { %1950 = vmatpush3.bf16.msra.mxu0 %v399_v49  ;;  %v1583_v49 = vld [vmem:[%s3391_s3 + $0x168] sm:$0xff] }
 0x1cf   :  { %1951 = vmatprep.subr.bf16.mxu0 %v2213_v0 }
 0x294   :  { %v266_v10 = vpop.f32.mrb[4].mxu0 }
 0x295   :  { %v267_v11 = vadd.f32 %v1527_v9, %v266_v10  ;;  %v1921_v12 = vpop.f32.mrb[5].mxu0  ;;  %v1561_v9 = vld [vmem:[%s3392_s0 + $0xe8] sm:$0xff] }
 0x296   :  { %v269_v13 = vpop.f32.mrb[6].mxu0  ;;  %v402_v10 = vpack.c.bf16 %v1561_v9, %v1560_v8  ;;  %v1563_v12 = vld [vmem:[%s3392_s0 + $0xf8] sm:$0xff] }
 0x297   :  { %v2472_v14 = vadd.f32 %v267_v11, %v122_v50  ;;  %v1922_v15 = vpop.f32.mrb[7].mxu0  ;;  %v1556_v50 = vld [vmem:[%s3392_s0 + $0xc0] sm:$0xff]  ;;  %v1562_v11 = vld [vmem:[%s3392_s0 + $0xf0] sm:$0xff] }
 0x298   :  { %v400_v52 = vpack.c.bf16 %v1557_v51, %v1556_v50  ;;  %v403_v13 = vpack.c.bf16 %v1563_v12, %v1562_v11  ;;  %v508_v50 = vpack.c.bf16 %v1583_v49, %v1582_v48  ;;  %v1584_v51 = vld [vmem:[%s3391_s3 + $0x170] sm:$0xff] }
 0x299   :  { %275 = vadd.xlane.f32.xlu0 %v2472_v14  ;;  %v279_v16 = vmul.f32 %v2472_v14, %v2472_v14  ;;  %v1612_v49 = vld [vmem:[%s3391_s3 + $0x190] sm:$0xff] }
 0x29a   :  { %1952 = vmatpush3.bf16.msra.mxu0 %v400_v52  ;;  %v1585_v52 = vld [vmem:[%s3391_s3 + $0x178] sm:$0xff] }
 0x29b   :  { %1953 = vmatprep.subr.bf16.mxu0 %v2213_v0  ;;  %v509_v53 = vpack.c.bf16 %v1585_v52, %v1584_v51  ;;  %v1614_v52 = vld [vmem:[%s3391_s3 + $0x1a0] sm:$0xff] }
 0x29d   :  { %280 = vadd.xlane.f32.xlu0 %v279_v16 }
 0x29e   :  { %1954 = vmatpush3.bf16.msra.mxu0 %v401_v55  ;;  %v1589_v55 = vld [vmem:[%s3392_s0 + $0x108] sm:$0xff] }
 0x29f   :  { %1955 = vmatprep.subr.bf16.mxu0 %v2213_v0 }
 0x2a2   :  { %1956 = vmatpush3.bf16.msra.mxu0 %v402_v10 }
 0x2a3   :  { %1957 = vmatprep.subr.bf16.mxu0 %v2213_v0 }
 0x2a6   :  { %1958 = vmatpush3.bf16.msra.mxu0 %v403_v13 }
 0x2a7   :  { %1983 = vmatprep.subr.bf16.mxu0 %v2213_v0 }
 0x326   :  { %v276_v56 = vpop.xlane.xlu0 %275 }
 0x327   :  { %v278_v57 = vmul.f32 0.03125, %v276_v56  ;;  %v1590_v56 = vld [vmem:[%s3392_s0 + $0x110] sm:$0xff] }
 0x329   :  { %v283_v59 = vmul.f32 %v278_v57, %v278_v57  ;;  %v285_v63 = vsub.f32 %v2472_v14, %v278_v57  ;;  %v1547_v14 = vld [vmem:[%s3394_s30 + $0x1] ss:$0 sm:$0xff]  ;;  %v577_v57 = vpack.c.bf16 %v1589_v55, %v1588_v54  ;;  %v1616_v55 = vld [vmem:[%s3391_s3 + $0x1b0] sm:$0xff] }
 0x32a   :  { %v281_v58 = vpop.xlane.xlu0 %280 }
 0x32b   :  { %v282_v60 = vmul.f32 0.03125, %v281_v58  ;;  %v1591_v58 = vld [vmem:[%s3392_s0 + $0x118] sm:$0xff] }
 0x32d   :  { %v284_v61 = vsub.f32 %v282_v60, %v283_v59  ;;  %v578_v59 = vpack.c.bf16 %v1591_v58, %v1590_v56  ;;  %v1592_v60 = vld [vmem:[%s3392_s0 + $0x120] sm:$0xff]  ;;  %v1617_v56 = vld [vmem:[%s3391_s3 + $0x1b8] sm:$0xff] }
 0x32e   :  { %v1618_v58 = vld [vmem:[%s3391_s3 + $0x1c0] sm:$0xff] }
 0x32f   :  { %v286_v62 = vadd.f32 1e-05, %v284_v61  ;;  %v1593_v61 = vld [vmem:[%s3392_s0 + $0x128] sm:$0xff] }
 0x331   :  { %2199 = vrsqrt.f32 %v286_v62  ;;  %v579_v62 = vpack.c.bf16 %v1593_v61, %v1592_v60  ;;  %v1620_v61 = vld [vmem:[%s3391_s3 + $0x1d0] sm:$0xff] }
 0x33b   :  { %v2200_v1 = vpop.eup %2199 }
 0x33c   :  { %v288_v3 = vmul.f32 %v2200_v1, %v285_v63  ;;  %v1594_v63 = vld [vmem:[%s3392_s0 + $0x130] sm:$0xff]  ;;  %v1595_v1 = vld [vmem:[%s3392_s0 + $0x138] sm:$0xff] }
 0x33e   :  { %v295_v5 = vmul.f32 %v1528_v2, %v288_v3  ;;  %v580_v2 = vpack.c.bf16 %v1595_v1, %v1594_v63  ;;  %v1596_v3 = vld [vmem:[%s3392_s0 + $0x140] sm:$0xff] }
 0x33f   :  { %v1622_v1 = vld [vmem:[%s3391_s3 + $0x1e0] sm:$0xff] }
 0x340   :  { %v302_v6 = vadd.f32 %v1529_v4, %v295_v5  ;;  %v1597_v4 = vld [vmem:[%s3392_s0 + $0x148] sm:$0xff] }
 0x341   :  { %v581_v5 = vpack.c.bf16 %v1597_v4, %v1596_v3  ;;  %v1624_v4 = vld [vmem:[%s3391_s3 + $0x1f0] sm:$0xff] }
 0x342   :  { %v320_v7 = vpack.c.bf16 %v302_v6, %v302_v6 }
 0x344   :  { %1940 = vmatmul.mubr.bf16.vlgmr.msra.gmra.mrb[4].mxu1 %v320_v7  ;;  %v1599_v7 = vld [vmem:[%s3392_s0 + $0x158] sm:$0xff] }
 0x345   :  { %1979 = vmatprep.mubr.msk.bf16.mxu1 %vm2214_vm1, %v2213_v0  ;;  %1964 = vmatpush3.bf16.msra.mxu1 %v502_v24  ;;  %v1600_v24 = vld [vmem:[%s3392_s0 + $0x160] sm:$0xff] }
 0x346   :  { %1965 = vmatprep.subr.bf16.mxu1 %v2213_v0 }
 0x349   :  { %1966 = vmatpush3.bf16.msra.mxu1 %v503_v35 }
 0x34a   :  { %1967 = vmatprep.subr.bf16.mxu1 %v2213_v0 }
 0x34d   :  { %1968 = vmatpush3.bf16.msra.mxu1 %v504_v38  ;;  %v1610_v38 = vld [vmem:[%s3391_s3 + $0x180] sm:$0xff] }
 0x34e   :  { %1969 = vmatprep.subr.bf16.mxu1 %v2213_v0  ;;  %v683_v40 = vpack.c.bf16 %v1611_v39, %v1610_v38 }
 0x351   :  { %1970 = vmatpush3.bf16.msra.mxu1 %v505_v41  ;;  %v1605_v41 = vld [vmem:[%s3364_s7 + $0x2] ss:$0 sm:$0xff] }
 0x352   :  { %1971 = vmatprep.subr.bf16.mxu1 %v2213_v0 }
 0x355   :  { %1972 = vmatpush3.bf16.msra.mxu1 %v506_v44 }
 0x356   :  { %1973 = vmatprep.subr.bf16.mxu1 %v2213_v0 }
 0x359   :  { %1974 = vmatpush3.bf16.msra.mxu1 %v507_v47 }
 0x35a   :  { %1975 = vmatprep.subr.bf16.mxu1 %v2213_v0 }
 0x35d   :  { %1976 = vmatpush3.bf16.msra.mxu1 %v508_v50  ;;  %v1613_v50 = vld [vmem:[%s3391_s3 + $0x198] sm:$0xff] }
 0x35e   :  { %1977 = vmatprep.subr.bf16.mxu1 %v2213_v0  ;;  %v684_v51 = vpack.c.bf16 %v1613_v50, %v1612_v49 }
 0x361   :  { %1978 = vmatpush3.bf16.msra.mxu1 %v509_v53  ;;  %v1615_v53 = vld [vmem:[%s3391_s3 + $0x1a8] sm:$0xff] }
 0x362   :  { %2003 = vmatprep.subr.bf16.mxu1 %v2213_v0  ;;  %v685_v54 = vpack.c.bf16 %v1615_v53, %v1614_v52 }
 0x417   :  { %v371_v15 = vpop.f32.mrb[4].mxu1 }
 0x418   :  { %v372_v16 = vadd.f32 %v1547_v14, %v371_v15  ;;  %v1941_v17 = vpop.f32.mrb[5].mxu1 }
 0x419   :  { %v374_v18 = vpop.f32.mrb[6].mxu1 }
 0x41a   :  { %v377_v19 = vmax.f32 %v372_v16, 0.0  ;;  %v1942_v20 = vpop.f32.mrb[7].mxu1  ;;  %v1568_v18 = vld [vmem:[%s3365_s8 + $0x1] ss:$0 sm:$0xff] }
 0x41b   :  { %v1569_v20 = vld [vmem:[%s3366_s9 + $0x1] ss:$0 sm:$0xff] }
 0x41c   :  { %v395_v21 = vpack.c.bf16 %v377_v19, %v377_v19 }
 0x41e   :  { %1960 = vmatmul.mubr.bf16.vlgmr.msra.gmra.mrb[8].mxu0 %v395_v21 }
 0x41f   :  { %1999 = vmatprep.mubr.msk.bf16.mxu0 %vm2214_vm1, %v2213_v0  ;;  %1984 = vmatpush3.bf16.msra.mxu0 %v577_v57  ;;  %v686_v57 = vpack.c.bf16 %v1617_v56, %v1616_v55  ;;  %v1651_v55 = vld [vmem:[%s3391_s3 + $0x208] sm:$0xff] }
 0x420   :  { %1985 = vmatprep.subr.bf16.mxu0 %v2213_v0 }
 0x423   :  { %1986 = vmatpush3.bf16.msra.mxu0 %v578_v59  ;;  %v1619_v59 = vld [vmem:[%s3391_s3 + $0x1c8] sm:$0xff] }
 0x424   :  { %1987 = vmatprep.subr.bf16.mxu0 %v2213_v0  ;;  %v687_v60 = vpack.c.bf16 %v1619_v59, %v1618_v58 }
 0x427   :  { %1988 = vmatpush3.bf16.msra.mxu0 %v579_v62  ;;  %v1621_v62 = vld [vmem:[%s3391_s3 + $0x1d8] sm:$0xff] }
 0x428   :  { %1989 = vmatprep.subr.bf16.mxu0 %v2213_v0  ;;  %v688_v63 = vpack.c.bf16 %v1621_v62, %v1620_v61 }
 0x42b   :  { %1990 = vmatpush3.bf16.msra.mxu0 %v580_v2  ;;  %v1623_v2 = vld [vmem:[%s3391_s3 + $0x1e8] sm:$0xff] }
 0x42c   :  { %1991 = vmatprep.subr.bf16.mxu0 %v2213_v0  ;;  %v689_v3 = vpack.c.bf16 %v1623_v2, %v1622_v1  ;;  %v1652_v2 = vld [vmem:[%s3391_s3 + $0x210] sm:$0xff] }
 0x42f   :  { %1992 = vmatpush3.bf16.msra.mxu0 %v581_v5  ;;  %v1625_v5 = vld [vmem:[%s3391_s3 + $0x1f8] sm:$0xff] }
 0x430   :  { %1993 = vmatprep.subr.bf16.mxu0 %v2213_v0 }
 0x4f1   :  { %v446_v26 = vpop.f32.mrb[8].mxu0 }
 0x4f2   :  { %v447_v27 = vadd.f32 %v1565_v25, %v446_v26  ;;  %v1961_v28 = vpop.f32.mrb[9].mxu0  ;;  %v1601_v25 = vld [vmem:[%s3392_s0 + $0x168] sm:$0xff] }
 0x4f3   :  { %v449_v29 = vpop.f32.mrb[10].mxu0  ;;  %v583_v26 = vpack.c.bf16 %v1601_v25, %v1600_v24  ;;  %v1603_v28 = vld [vmem:[%s3392_s0 + $0x178] sm:$0xff] }
 0x4f4   :  { %v2606_v30 = vadd.f32 %v447_v27, %v302_v6  ;;  %v1962_v31 = vpop.f32.mrb[11].mxu0  ;;  %v1598_v6 = vld [vmem:[%s3392_s0 + $0x150] sm:$0xff] }
 0x4f5   :  { %v582_v8 = vpack.c.bf16 %v1599_v7, %v1598_v6  ;;  %v1602_v27 = vld [vmem:[%s3392_s0 + $0x170] sm:$0xff]  ;;  %v690_v6 = vpack.c.bf16 %v1625_v5, %v1624_v4  ;;  %v1628_v7 = vld [vmem:[%s3392_s0 + $0x180] sm:$0xff] }
 0x4f6   :  { %457 = vadd.xlane.f32.xlu1 %v2606_v30  ;;  %v460_v32 = vmul.f32 %v2606_v30, %v2606_v30  ;;  %v584_v29 = vpack.c.bf16 %v1603_v28, %v1602_v27  ;;  %v1654_v5 = vld [vmem:[%s3391_s3 + $0x220] sm:$0xff] }
 0x4f7   :  { %1994 = vmatpush3.bf16.msra.mxu0 %v582_v8  ;;  %v1629_v8 = vld [vmem:[%s3392_s0 + $0x188] sm:$0xff] }
 0x4f8   :  { %1995 = vmatprep.subr.bf16.mxu0 %v2213_v0 }
 0x4fa   :  { %461 = vadd.xlane.f32.xlu1 %v460_v32 }
 0x4fb   :  { %1996 = vmatpush3.bf16.msra.mxu0 %v583_v26 }
 0x4fc   :  { %1997 = vmatprep.subr.bf16.mxu0 %v2213_v0 }
 0x4ff   :  { %1998 = vmatpush3.bf16.msra.mxu0 %v584_v29 }
 0x500   :  { %2023 = vmatprep.subr.bf16.mxu0 %v2213_v0 }
 0x583   :  { %v458_v9 = vpop.xlane.xlu1 %457 }
 0x584   :  { %v459_v10 = vmul.f32 0.03125, %v458_v9  ;;  %v1630_v9 = vld [vmem:[%s3392_s0 + $0x190] sm:$0xff] }
 0x586   :  { %v464_v12 = vmul.f32 %v459_v10, %v459_v10  ;;  %v466_v16 = vsub.f32 %v2606_v30, %v459_v10  ;;  %v1587_v30 = vld [vmem:[%s3394_s30 + $0x2] ss:$0 sm:$0xff]  ;;  %v758_v10 = vpack.c.bf16 %v1629_v8, %v1628_v7  ;;  %v1656_v8 = vld [vmem:[%s3391_s3 + $0x230] sm:$0xff] }
 0x587   :  { %v462_v11 = vpop.xlane.xlu1 %461 }
 0x588   :  { %v463_v13 = vmul.f32 0.03125, %v462_v11  ;;  %v1631_v11 = vld [vmem:[%s3392_s0 + $0x198] sm:$0xff] }
 0x58a   :  { %v465_v14 = vsub.f32 %v463_v13, %v464_v12  ;;  %v759_v12 = vpack.c.bf16 %v1631_v11, %v1630_v9  ;;  %v1632_v13 = vld [vmem:[%s3392_s0 + $0x1a0] sm:$0xff]  ;;  %v1657_v9 = vld [vmem:[%s3391_s3 + $0x238] sm:$0xff] }
 0x58b   :  { %v1658_v11 = vld [vmem:[%s3391_s3 + $0x240] sm:$0xff] }
 0x58c   :  { %v467_v15 = vadd.f32 1e-05, %v465_v14  ;;  %v1633_v14 = vld [vmem:[%s3392_s0 + $0x1a8] sm:$0xff] }
 0x58e   :  { %2201 = vrsqrt.f32 %v467_v15  ;;  %v760_v15 = vpack.c.bf16 %v1633_v14, %v1632_v13  ;;  %v1660_v14 = vld [vmem:[%s3391_s3 + $0x250] sm:$0xff] }
 0x598   :  { %v2202_v17 = vpop.eup %2201 }
 0x599   :  { %v469_v19 = vmul.f32 %v2202_v17, %v466_v16  ;;  %v1634_v16 = vld [vmem:[%s3392_s0 + $0x1b0] sm:$0xff]  ;;  %v1635_v17 = vld [vmem:[%s3392_s0 + $0x1b8] sm:$0xff] }
 0x59b   :  { %v476_v21 = vmul.f32 %v1568_v18, %v469_v19  ;;  %v761_v18 = vpack.c.bf16 %v1635_v17, %v1634_v16  ;;  %v1636_v19 = vld [vmem:[%s3392_s0 + $0x1c0] sm:$0xff] }
 0x59c   :  { %v1662_v17 = vld [vmem:[%s3391_s3 + $0x260] sm:$0xff] }
 0x59d   :  { %v483_v22 = vadd.f32 %v1569_v20, %v476_v21  ;;  %v1637_v20 = vld [vmem:[%s3392_s0 + $0x1c8] sm:$0xff] }
 0x59e   :  { %v762_v21 = vpack.c.bf16 %v1637_v20, %v1636_v19  ;;  %v1664_v20 = vld [vmem:[%s3391_s3 + $0x270] sm:$0xff] }
 0x59f   :  { %v501_v23 = vpack.c.bf16 %v483_v22, %v483_v22 }
 0x5a1   :  { %1980 = vmatmul.mubr.bf16.vlgmr.msra.gmra.mrb[8].mxu1 %v501_v23  ;;  %v1639_v23 = vld [vmem:[%s3392_s0 + $0x1d8] sm:$0xff] }
 0x5a2   :  { %2019 = vmatprep.mubr.msk.bf16.mxu1 %vm2214_vm1, %v2213_v0  ;;  %2004 = vmatpush3.bf16.msra.mxu1 %v683_v40  ;;  %v1640_v40 = vld [vmem:[%s3392_s0 + $0x1e0] sm:$0xff] }
 0x5a3   :  { %2005 = vmatprep.subr.bf16.mxu1 %v2213_v0 }
 0x5a6   :  { %2006 = vmatpush3.bf16.msra.mxu1 %v684_v51 }
 0x5a7   :  { %2007 = vmatprep.subr.bf16.mxu1 %v2213_v0 }
 0x5aa   :  { %2008 = vmatpush3.bf16.msra.mxu1 %v685_v54  ;;  %v1650_v54 = vld [vmem:[%s3391_s3 + $0x200] sm:$0xff] }
 0x5ab   :  { %2009 = vmatprep.subr.bf16.mxu1 %v2213_v0  ;;  %v864_v56 = vpack.c.bf16 %v1651_v55, %v1650_v54 }
 0x5ae   :  { %2010 = vmatpush3.bf16.msra.mxu1 %v686_v57  ;;  %v1645_v57 = vld [vmem:[%s3364_s7 + $0x3] ss:$0 sm:$0xff] }
 0x5af   :  { %2011 = vmatprep.subr.bf16.mxu1 %v2213_v0 }
 0x5b2   :  { %2012 = vmatpush3.bf16.msra.mxu1 %v687_v60 }
 0x5b3   :  { %2013 = vmatprep.subr.bf16.mxu1 %v2213_v0 }
 0x5b6   :  { %2014 = vmatpush3.bf16.msra.mxu1 %v688_v63 }
 0x5b7   :  { %2015 = vmatprep.subr.bf16.mxu1 %v2213_v0 }
 0x5ba   :  { %2016 = vmatpush3.bf16.msra.mxu1 %v689_v3  ;;  %v1653_v3 = vld [vmem:[%s3391_s3 + $0x218] sm:$0xff] }
 0x5bb   :  { %2017 = vmatprep.subr.bf16.mxu1 %v2213_v0  ;;  %v865_v4 = vpack.c.bf16 %v1653_v3, %v1652_v2 }
 0x5be   :  { %2018 = vmatpush3.bf16.msra.mxu1 %v690_v6  ;;  %v1655_v6 = vld [vmem:[%s3391_s3 + $0x228] sm:$0xff] }
 0x5bf   :  { %2043 = vmatprep.subr.bf16.mxu1 %v2213_v0  ;;  %v866_v7 = vpack.c.bf16 %v1655_v6, %v1654_v5 }
 0x674   :  { %v552_v31 = vpop.f32.mrb[8].mxu1 }
 0x675   :  { %v553_v32 = vadd.f32 %v1587_v30, %v552_v31  ;;  %v1981_v33 = vpop.f32.mrb[9].mxu1 }
 0x676   :  { %v555_v34 = vpop.f32.mrb[10].mxu1 }
 0x677   :  { %v558_v35 = vmax.f32 %v553_v32, 0.0  ;;  %v1982_v36 = vpop.f32.mrb[11].mxu1  ;;  %v1608_v34 = vld [vmem:[%s3365_s8 + $0x2] ss:$0 sm:$0xff] }
 0x678   :  { %v1609_v36 = vld [vmem:[%s3366_s9 + $0x2] ss:$0 sm:$0xff] }
 0x679   :  { %v576_v37 = vpack.c.bf16 %v558_v35, %v558_v35 }
 0x67b   :  { %2000 = vmatmul.mubr.bf16.vlgmr.msra.gmra.mrb[12].mxu0 %v576_v37 }
 0x67c   :  { %2039 = vmatprep.mubr.msk.bf16.mxu0 %vm2214_vm1, %v2213_v0  ;;  %2024 = vmatpush3.bf16.msra.mxu0 %v758_v10  ;;  %v867_v10 = vpack.c.bf16 %v1657_v9, %v1656_v8  ;;  %v1691_v8 = vld [vmem:[%s3391_s3 + $0x288] sm:$0xff] }
 0x67d   :  { %2025 = vmatprep.subr.bf16.mxu0 %v2213_v0 }
 0x680   :  { %2026 = vmatpush3.bf16.msra.mxu0 %v759_v12  ;;  %v1659_v12 = vld [vmem:[%s3391_s3 + $0x248] sm:$0xff] }
 0x681   :  { %2027 = vmatprep.subr.bf16.mxu0 %v2213_v0  ;;  %v868_v13 = vpack.c.bf16 %v1659_v12, %v1658_v11 }
 0x684   :  { %2028 = vmatpush3.bf16.msra.mxu0 %v760_v15  ;;  %v1661_v15 = vld [vmem:[%s3391_s3 + $0x258] sm:$0xff] }
 0x685   :  { %2029 = vmatprep.subr.bf16.mxu0 %v2213_v0  ;;  %v869_v16 = vpack.c.bf16 %v1661_v15, %v1660_v14 }
 0x688   :  { %2030 = vmatpush3.bf16.msra.mxu0 %v761_v18  ;;  %v1663_v18 = vld [vmem:[%s3391_s3 + $0x268] sm:$0xff] }
 0x689   :  { %2031 = vmatprep.subr.bf16.mxu0 %v2213_v0  ;;  %v870_v19 = vpack.c.bf16 %v1663_v18, %v1662_v17  ;;  %v1692_v18 = vld [vmem:[%s3391_s3 + $0x290] sm:$0xff] }
 0x68c   :  { %2032 = vmatpush3.bf16.msra.mxu0 %v762_v21  ;;  %v1665_v21 = vld [vmem:[%s3391_s3 + $0x278] sm:$0xff] }
 0x68d   :  { %2033 = vmatprep.subr.bf16.mxu0 %v2213_v0 }
 0x74e   :  { %v627_v42 = vpop.f32.mrb[12].mxu0 }
 0x74f   :  { %v628_v43 = vadd.f32 %v1605_v41, %v627_v42  ;;  %v2001_v44 = vpop.f32.mrb[13].mxu0  ;;  %v1641_v41 = vld [vmem:[%s3392_s0 + $0x1e8] sm:$0xff] }
 0x750   :  { %v630_v45 = vpop.f32.mrb[14].mxu0  ;;  %v764_v42 = vpack.c.bf16 %v1641_v41, %v1640_v40  ;;  %v1643_v44 = vld [vmem:[%s3392_s0 + $0x1f8] sm:$0xff] }
 0x751   :  { %v2740_v46 = vadd.f32 %v628_v43, %v483_v22  ;;  %v2002_v47 = vpop.f32.mrb[15].mxu0  ;;  %v1638_v22 = vld [vmem:[%s3392_s0 + $0x1d0] sm:$0xff] }
 0x752   :  { %v763_v24 = vpack.c.bf16 %v1639_v23, %v1638_v22  ;;  %v1642_v43 = vld [vmem:[%s3392_s0 + $0x1f0] sm:$0xff]  ;;  %v871_v22 = vpack.c.bf16 %v1665_v21, %v1664_v20  ;;  %v1668_v23 = vld [vmem:[%s3392_s0 + $0x200] sm:$0xff] }
 0x753   :  { %638 = vadd.xlane.f32.xlu0 %v2740_v46  ;;  %v641_v48 = vmul.f32 %v2740_v46, %v2740_v46  ;;  %v765_v45 = vpack.c.bf16 %v1643_v44, %v1642_v43  ;;  %v1694_v21 = vld [vmem:[%s3391_s3 + $0x2a0] sm:$0xff] }
 0x754   :  { %2034 = vmatpush3.bf16.msra.mxu0 %v763_v24  ;;  %v1669_v24 = vld [vmem:[%s3392_s0 + $0x208] sm:$0xff] }
 0x755   :  { %642 = vadd.xlane.f32.xlu1 %v641_v48  ;;  %2035 = vmatprep.subr.bf16.mxu0 %v2213_v0 }
 0x758   :  { %2036 = vmatpush3.bf16.msra.mxu0 %v764_v42 }
 0x759   :  { %2037 = vmatprep.subr.bf16.mxu0 %v2213_v0 }
 0x75c   :  { %2038 = vmatpush3.bf16.msra.mxu0 %v765_v45 }
 0x75d   :  { %2063 = vmatprep.subr.bf16.mxu0 %v2213_v0 }
 0x7e0   :  { %v639_v25 = vpop.xlane.xlu0 %638 }
 0x7e1   :  { %v640_v26 = vmul.f32 0.03125, %v639_v25  ;;  %v1670_v25 = vld [vmem:[%s3392_s0 + $0x210] sm:$0xff] }
 0x7e2   :  { %v643_v27 = vpop.xlane.xlu1 %642 }
 0x7e3   :  { %v645_v28 = vmul.f32 %v640_v26, %v640_v26  ;;  %v644_v29 = vmul.f32 0.03125, %v643_v27  ;;  %v647_v32 = vsub.f32 %v2740_v46, %v640_v26  ;;  %v1627_v46 = vld [vmem:[%s3394_s30 + $0x3] ss:$0 sm:$0xff]  ;;  %v939_v26 = vpack.c.bf16 %v1669_v24, %v1668_v23  ;;  %v1671_v27 = vld [vmem:[%s3392_s0 + $0x218] sm:$0xff]  ;;  %v1696_v24 = vld [vmem:[%s3391_s3 + $0x2b0] sm:$0xff] }
 0x7e5   :  { %v646_v30 = vsub.f32 %v644_v29, %v645_v28  ;;  %v940_v28 = vpack.c.bf16 %v1671_v27, %v1670_v25  ;;  %v1672_v29 = vld [vmem:[%s3392_s0 + $0x220] sm:$0xff]  ;;  %v1697_v25 = vld [vmem:[%s3391_s3 + $0x2b8] sm:$0xff] }
 0x7e6   :  { %v1698_v27 = vld [vmem:[%s3391_s3 + $0x2c0] sm:$0xff] }
 0x7e7   :  { %v648_v31 = vadd.f32 1e-05, %v646_v30  ;;  %v1673_v30 = vld [vmem:[%s3392_s0 + $0x228] sm:$0xff] }
 0x7e9   :  { %2203 = vrsqrt.f32 %v648_v31  ;;  %v941_v31 = vpack.c.bf16 %v1673_v30, %v1672_v29  ;;  %v1700_v30 = vld [vmem:[%s3391_s3 + $0x2d0] sm:$0xff] }
 0x7f3   :  { %v2204_v33 = vpop.eup %2203 }
 0x7f4   :  { %v650_v35 = vmul.f32 %v2204_v33, %v647_v32  ;;  %v1674_v32 = vld [vmem:[%s3392_s0 + $0x230] sm:$0xff]  ;;  %v1675_v33 = vld [vmem:[%s3392_s0 + $0x238] sm:$0xff] }
 0x7f6   :  { %v657_v37 = vmul.f32 %v1608_v34, %v650_v35  ;;  %v942_v34 = vpack.c.bf16 %v1675_v33, %v1674_v32  ;;  %v1676_v35 = vld [vmem:[%s3392_s0 + $0x240] sm:$0xff] }
 0x7f7   :  { %v1702_v33 = vld [vmem:[%s3391_s3 + $0x2e0] sm:$0xff] }
 0x7f8   :  { %v664_v38 = vadd.f32 %v1609_v36, %v657_v37  ;;  %v1677_v36 = vld [vmem:[%s3392_s0 + $0x248] sm:$0xff] }
 0x7f9   :  { %v943_v37 = vpack.c.bf16 %v1677_v36, %v1676_v35  ;;  %v1704_v36 = vld [vmem:[%s3391_s3 + $0x2f0] sm:$0xff] }
 0x7fa   :  { %v682_v39 = vpack.c.bf16 %v664_v38, %v664_v38 }
 0x7fc   :  { %2020 = vmatmul.mubr.bf16.vlgmr.msra.gmra.mrb[12].mxu1 %v682_v39  ;;  %v1679_v39 = vld [vmem:[%s3392_s0 + $0x258] sm:$0xff] }
 0x7fd   :  { %2059 = vmatprep.mubr.msk.bf16.mxu1 %vm2214_vm1, %v2213_v0  ;;  %2044 = vmatpush3.bf16.msra.mxu1 %v864_v56  ;;  %v1680_v56 = vld [vmem:[%s3392_s0 + $0x260] sm:$0xff] }
 0x7fe   :  { %2045 = vmatprep.subr.bf16.mxu1 %v2213_v0 }
 0x801   :  { %2046 = vmatpush3.bf16.msra.mxu1 %v865_v4 }
 0x802   :  { %2047 = vmatprep.subr.bf16.mxu1 %v2213_v0 }
 0x805   :  { %2048 = vmatpush3.bf16.msra.mxu1 %v866_v7  ;;  %v1690_v7 = vld [vmem:[%s3391_s3 + $0x280] sm:$0xff] }
 0x806   :  { %2049 = vmatprep.subr.bf16.mxu1 %v2213_v0  ;;  %v1045_v9 = vpack.c.bf16 %v1691_v8, %v1690_v7 }
 0x809   :  { %2050 = vmatpush3.bf16.msra.mxu1 %v867_v10  ;;  %v1685_v10 = vld [vmem:[%s3364_s7 + $0x4] ss:$0 sm:$0xff] }
 0x80a   :  { %2051 = vmatprep.subr.bf16.mxu1 %v2213_v0 }
 0x80d   :  { %2052 = vmatpush3.bf16.msra.mxu1 %v868_v13 }
 0x80e   :  { %2053 = vmatprep.subr.bf16.mxu1 %v2213_v0 }
 0x811   :  { %2054 = vmatpush3.bf16.msra.mxu1 %v869_v16 }
 0x812   :  { %2055 = vmatprep.subr.bf16.mxu1 %v2213_v0 }
 0x815   :  { %2056 = vmatpush3.bf16.msra.mxu1 %v870_v19  ;;  %v1693_v19 = vld [vmem:[%s3391_s3 + $0x298] sm:$0xff] }
 0x816   :  { %2057 = vmatprep.subr.bf16.mxu1 %v2213_v0  ;;  %v1046_v20 = vpack.c.bf16 %v1693_v19, %v1692_v18 }
 0x819   :  { %2058 = vmatpush3.bf16.msra.mxu1 %v871_v22  ;;  %v1695_v22 = vld [vmem:[%s3391_s3 + $0x2a8] sm:$0xff] }
 0x81a   :  { %2083 = vmatprep.subr.bf16.mxu1 %v2213_v0  ;;  %v1047_v23 = vpack.c.bf16 %v1695_v22, %v1694_v21 }
 0x8cf   :  { %v733_v47 = vpop.f32.mrb[12].mxu1 }
 0x8d0   :  { %v734_v48 = vadd.f32 %v1627_v46, %v733_v47  ;;  %v2021_v49 = vpop.f32.mrb[13].mxu1 }
 0x8d1   :  { %v736_v50 = vpop.f32.mrb[14].mxu1 }
 0x8d2   :  { %v739_v51 = vmax.f32 %v734_v48, 0.0  ;;  %v2022_v52 = vpop.f32.mrb[15].mxu1  ;;  %v1648_v50 = vld [vmem:[%s3365_s8 + $0x3] ss:$0 sm:$0xff] }
 0x8d3   :  { %v1649_v52 = vld [vmem:[%s3366_s9 + $0x3] ss:$0 sm:$0xff] }
 0x8d4   :  { %v757_v53 = vpack.c.bf16 %v739_v51, %v739_v51 }
 0x8d6   :  { %2040 = vmatmul.mubr.bf16.vlgmr.msra.gmra.mrb[16].mxu0 %v757_v53 }
 0x8d7   :  { %2079 = vmatprep.mubr.msk.bf16.mxu0 %vm2214_vm1, %v2213_v0  ;;  %2064 = vmatpush3.bf16.msra.mxu0 %v939_v26  ;;  %v1048_v26 = vpack.c.bf16 %v1697_v25, %v1696_v24  ;;  %v1209_v24 = vld [vmem:[%s3367_s14 + $0x8] sm:$0xff]  ;;  %v1280_v25 = vld [vmem:[%s3368_s10] sm:$0xff] }
 0x8d8   :  { %2065 = vmatprep.subr.bf16.mxu0 %v2213_v0 }
 0x8db   :  { %2066 = vmatpush3.bf16.msra.mxu0 %v940_v28  ;;  %v1699_v28 = vld [vmem:[%s3391_s3 + $0x2c8] sm:$0xff] }
 0x8dc   :  { %2067 = vmatprep.subr.bf16.mxu0 %v2213_v0  ;;  %v1049_v29 = vpack.c.bf16 %v1699_v28, %v1698_v27  ;;  %v1281_v27 = vld [vmem:[%s3368_s10 + $0x8] sm:$0xff] }
 0x8dd   :  { %v1296_v28 = vpack.c.bf16 %v1281_v27, %v1280_v25  ;;  %v1728_v25 = vld [vmem:[%s3365_s8 + $0x5] ss:$0 sm:$0xff] }
 0x8de   :  { %v1729_v27 = vld [vmem:[%s3366_s9 + $0x5] ss:$0 sm:$0xff] }
 0x8df   :  { %2068 = vmatpush3.bf16.msra.mxu0 %v941_v31  ;;  %v1701_v31 = vld [vmem:[%s3391_s3 + $0x2d8] sm:$0xff] }
 0x8e0   :  { %2069 = vmatprep.subr.bf16.mxu0 %v2213_v0  ;;  %v1050_v32 = vpack.c.bf16 %v1701_v31, %v1700_v30 }
 0x8e3   :  { %2070 = vmatpush3.bf16.msra.mxu0 %v942_v34  ;;  %v1703_v34 = vld [vmem:[%s3391_s3 + $0x2e8] sm:$0xff] }
 0x8e4   :  { %2071 = vmatprep.subr.bf16.mxu0 %v2213_v0  ;;  %v1051_v35 = vpack.c.bf16 %v1703_v34, %v1702_v33 }
 0x8e7   :  { %2072 = vmatpush3.bf16.msra.mxu0 %v943_v37  ;;  %v1705_v37 = vld [vmem:[%s3391_s3 + $0x2f8] sm:$0xff] }
 0x8e8   :  { %2073 = vmatprep.subr.bf16.mxu0 %v2213_v0 }
 0x9a9   :  { %v808_v58 = vpop.f32.mrb[16].mxu0 }
 0x9aa   :  { %v809_v59 = vadd.f32 %v1645_v57, %v808_v58  ;;  %v2041_v60 = vpop.f32.mrb[17].mxu0  ;;  %v1681_v57 = vld [vmem:[%s3392_s0 + $0x268] sm:$0xff] }
 0x9ab   :  { %v811_v61 = vpop.f32.mrb[18].mxu0  ;;  %v945_v58 = vpack.c.bf16 %v1681_v57, %v1680_v56  ;;  %v1683_v60 = vld [vmem:[%s3392_s0 + $0x278] sm:$0xff] }
 0x9ac   :  { %v2874_v62 = vadd.f32 %v809_v59, %v664_v38  ;;  %v2042_v63 = vpop.f32.mrb[19].mxu0  ;;  %v1678_v38 = vld [vmem:[%s3392_s0 + $0x250] sm:$0xff] }
 0x9ad   :  { %v944_v40 = vpack.c.bf16 %v1679_v39, %v1678_v38  ;;  %v1682_v59 = vld [vmem:[%s3392_s0 + $0x270] sm:$0xff]  ;;  %v1052_v38 = vpack.c.bf16 %v1705_v37, %v1704_v36  ;;  %v1708_v39 = vld [vmem:[%s3392_s0 + $0x280] sm:$0xff] }
 0x9ae   :  { %819 = vadd.xlane.f32.xlu0 %v2874_v62  ;;  %v822_v1 = vmul.f32 %v2874_v62, %v2874_v62  ;;  %v946_v61 = vpack.c.bf16 %v1683_v60, %v1682_v59  ;;  %v1210_v37 = vld [vmem:[%s3367_s14 + $0x10] sm:$0xff] }
 0x9af   :  { %2074 = vmatpush3.bf16.msra.mxu0 %v944_v40  ;;  %v1709_v40 = vld [vmem:[%s3392_s0 + $0x288] sm:$0xff] }
 0x9b0   :  { %823 = vadd.xlane.f32.xlu1 %v822_v1  ;;  %2075 = vmatprep.subr.bf16.mxu0 %v2213_v0 }
 0x9b3   :  { %2076 = vmatpush3.bf16.msra.mxu0 %v945_v58 }
 0x9b4   :  { %2077 = vmatprep.subr.bf16.mxu0 %v2213_v0 }
 0x9b7   :  { %2078 = vmatpush3.bf16.msra.mxu0 %v946_v61 }
 0x9b8   :  { %2103 = vmatprep.subr.bf16.mxu0 %v2213_v0 }
 0xa3b   :  { %v820_v41 = vpop.xlane.xlu0 %819 }
 0xa3c   :  { %v821_v42 = vmul.f32 0.03125, %v820_v41  ;;  %v1710_v41 = vld [vmem:[%s3392_s0 + $0x290] sm:$0xff] }
 0xa3d   :  { %v824_v43 = vpop.xlane.xlu1 %823 }
 0xa3e   :  { %v826_v44 = vmul.f32 %v821_v42, %v821_v42  ;;  %v825_v45 = vmul.f32 0.03125, %v824_v43  ;;  %v828_v48 = vsub.f32 %v2874_v62, %v821_v42  ;;  %v1667_v62 = vld [vmem:[%s3394_s30 + $0x4] ss:$0 sm:$0xff]  ;;  %v1120_v42 = vpack.c.bf16 %v1709_v40, %v1708_v39  ;;  %v1711_v43 = vld [vmem:[%s3392_s0 + $0x298] sm:$0xff]  ;;  %v1282_v39 = vld [vmem:[%s3368_s10 + $0x10] sm:$0xff] }
 0xa40   :  { %v827_v46 = vsub.f32 %v825_v45, %v826_v44  ;;  %v1121_v44 = vpack.c.bf16 %v1711_v43, %v1710_v41  ;;  %v1712_v45 = vld [vmem:[%s3392_s0 + $0x2a0] sm:$0xff]  ;;  %v1283_v41 = vld [vmem:[%s3368_s10 + $0x18] sm:$0xff] }
 0xa41   :  { %v1212_v43 = vld [vmem:[%s3367_s14 + $0x20] sm:$0xff] }
 0xa42   :  { %v829_v47 = vadd.f32 1e-05, %v827_v46  ;;  %v1713_v46 = vld [vmem:[%s3392_s0 + $0x2a8] sm:$0xff] }
 0xa44   :  { %2205 = vrsqrt.f32 %v829_v47  ;;  %v1122_v47 = vpack.c.bf16 %v1713_v46, %v1712_v45  ;;  %v1284_v45 = vld [vmem:[%s3368_s10 + $0x20] sm:$0xff] }
 0xa4e   :  { %v2206_v49 = vpop.eup %2205 }
 0xa4f   :  { %v831_v51 = vmul.f32 %v2206_v49, %v828_v48  ;;  %v1714_v48 = vld [vmem:[%s3392_s0 + $0x2b0] sm:$0xff]  ;;  %v1715_v49 = vld [vmem:[%s3392_s0 + $0x2b8] sm:$0xff] }
 0xa51   :  { %v838_v53 = vmul.f32 %v1648_v50, %v831_v51  ;;  %v1123_v50 = vpack.c.bf16 %v1715_v49, %v1714_v48  ;;  %v1716_v51 = vld [vmem:[%s3392_s0 + $0x2c0] sm:$0xff]  ;;  %v1214_v49 = vld [vmem:[%s3367_s14 + $0x30] sm:$0xff] }
 0xa53   :  { %v845_v54 = vadd.f32 %v1649_v52, %v838_v53  ;;  %v1717_v52 = vld [vmem:[%s3392_s0 + $0x2c8] sm:$0xff] }
 0xa54   :  { %v1124_v53 = vpack.c.bf16 %v1717_v52, %v1716_v51  ;;  %v1286_v51 = vld [vmem:[%s3368_s10 + $0x30] sm:$0xff] }
 0xa55   :  { %v863_v55 = vpack.c.bf16 %v845_v54, %v845_v54 }
 0xa57   :  { %2060 = vmatmul.mubr.bf16.vlgmr.msra.gmra.mrb[16].mxu1 %v863_v55  ;;  %v1719_v55 = vld [vmem:[%s3392_s0 + $0x2d8] sm:$0xff] }
 0xa58   :  { %2099 = vmatprep.mubr.msk.bf16.mxu1 %vm2214_vm1, %v2213_v0  ;;  %2084 = vmatpush3.bf16.msra.mxu1 %v1045_v9  ;;  %v1720_v9 = vld [vmem:[%s3392_s0 + $0x2e0] sm:$0xff] }
 0xa59   :  { %2085 = vmatprep.subr.bf16.mxu1 %v2213_v0 }
 0xa5c   :  { %2086 = vmatpush3.bf16.msra.mxu1 %v1046_v20 }
 0xa5d   :  { %2087 = vmatprep.subr.bf16.mxu1 %v2213_v0 }
 0xa60   :  { %2088 = vmatpush3.bf16.msra.mxu1 %v1047_v23  ;;  %v1208_v23 = vld [vmem:[%s3367_s14] sm:$0xff] }
 0xa61   :  { %2089 = vmatprep.subr.bf16.mxu1 %v2213_v0 }
 0xa64   :  { %2090 = vmatpush3.bf16.msra.mxu1 %v1048_v26  ;;  %v1225_v26 = vpack.c.bf16 %v1209_v24, %v1208_v23 }
 0xa65   :  { %2091 = vmatprep.subr.bf16.mxu1 %v2213_v0 }
 0xa68   :  { %2092 = vmatpush3.bf16.msra.mxu1 %v1049_v29  ;;  %v1725_v29 = vld [vmem:[%s3364_s7 + $0x5] ss:$0 sm:$0xff] }
 0xa69   :  { %2093 = vmatprep.subr.bf16.mxu1 %v2213_v0 }
 0xa6c   :  { %2094 = vmatpush3.bf16.msra.mxu1 %v1050_v32 }
 0xa6d   :  { %2095 = vmatprep.subr.bf16.mxu1 %v2213_v0 }
 0xa70   :  { %2096 = vmatpush3.bf16.msra.mxu1 %v1051_v35 }
 0xa71   :  { %2097 = vmatprep.subr.bf16.mxu1 %v2213_v0 }
 0xa74   :  { %2098 = vmatpush3.bf16.msra.mxu1 %v1052_v38  ;;  %v1211_v38 = vld [vmem:[%s3367_s14 + $0x18] sm:$0xff] }
 0xa75   :  { %2123 = vmatprep.subr.bf16.mxu1 %v2213_v0  ;;  %v1226_v40 = vpack.c.bf16 %v1211_v38, %v1210_v37  ;;  %v1356_v37 = vld [vmem:[%s3369_s12 + $0x20] sm:$0xff]  ;;  %v1357_v38 = vld [vmem:[%s3369_s12 + $0x28] sm:$0xff] }
 0xb2a   :  { %v914_v63 = vpop.f32.mrb[16].mxu1 }
 0xb2b   :  { %v915_v1 = vadd.f32 %v1667_v62, %v914_v63  ;;  %v2061_v2 = vpop.f32.mrb[17].mxu1 }
 0xb2c   :  { %v917_v3 = vpop.f32.mrb[18].mxu1 }
 0xb2d   :  { %v920_v4 = vmax.f32 %v915_v1, 0.0  ;;  %v2062_v5 = vpop.f32.mrb[19].mxu1  ;;  %v1688_v3 = vld [vmem:[%s3365_s8 + $0x4] ss:$0 sm:$0xff] }
 0xb2e   :  { %v1689_v5 = vld [vmem:[%s3366_s9 + $0x4] ss:$0 sm:$0xff] }
 0xb2f   :  { %v938_v6 = vpack.c.bf16 %v920_v4, %v920_v4 }
 0xb31   :  { %2080 = vmatmul.mubr.bf16.vlgmr.msra.gmra.mrb[20].mxu0 %v938_v6 }
 0xb32   :  { %2119 = vmatprep.mubr.msk.bf16.mxu0 %vm2214_vm1, %v2213_v0  ;;  %2104 = vmatpush3.bf16.msra.mxu0 %v1120_v42  ;;  %v1297_v42 = vpack.c.bf16 %v1283_v41, %v1282_v39  ;;  %v1371_v39 = vpack.c.bf16 %v1357_v38, %v1356_v37  ;;  %v1359_v41 = vld [vmem:[%s3369_s12 + $0x38] sm:$0xff] }
 0xb33   :  { %2105 = vmatprep.subr.bf16.mxu0 %v2213_v0 }
 0xb36   :  { %2106 = vmatpush3.bf16.msra.mxu0 %v1121_v44  ;;  %v1213_v44 = vld [vmem:[%s3367_s14 + $0x28] sm:$0xff] }
 0xb37   :  { %2107 = vmatprep.subr.bf16.mxu0 %v2213_v0  ;;  %v1227_v46 = vpack.c.bf16 %v1213_v44, %v1212_v43  ;;  %v1360_v43 = vld [vmem:[%s3369_s12 + $0x40] sm:$0xff]  ;;  %v1361_v44 = vld [vmem:[%s3369_s12 + $0x48] sm:$0xff] }
 0xb3a   :  { %2108 = vmatpush3.bf16.msra.mxu0 %v1122_v47  ;;  %v1285_v47 = vld [vmem:[%s3368_s10 + $0x28] sm:$0xff] }
 0xb3b   :  { %2109 = vmatprep.subr.bf16.mxu0 %v2213_v0  ;;  %v1298_v48 = vpack.c.bf16 %v1285_v47, %v1284_v45  ;;  %v1373_v45 = vpack.c.bf16 %v1361_v44, %v1360_v43  ;;  %v1363_v47 = vld [vmem:[%s3369_s12 + $0x58] sm:$0xff] }
 0xb3e   :  { %2110 = vmatpush3.bf16.msra.mxu0 %v1123_v50  ;;  %v1215_v50 = vld [vmem:[%s3367_s14 + $0x38] sm:$0xff] }
 0xb3f   :  { %2111 = vmatprep.subr.bf16.mxu0 %v2213_v0  ;;  %v1228_v52 = vpack.c.bf16 %v1215_v50, %v1214_v49  ;;  %v1364_v49 = vld [vmem:[%s3369_s12 + $0x60] sm:$0xff]  ;;  %v1365_v50 = vld [vmem:[%s3369_s12 + $0x68] sm:$0xff] }
 0xb42   :  { %2112 = vmatpush3.bf16.msra.mxu0 %v1124_v53  ;;  %v1287_v53 = vld [vmem:[%s3368_s10 + $0x38] sm:$0xff] }
 0xb43   :  { %2113 = vmatprep.subr.bf16.mxu0 %v2213_v0 }
 0xc04   :  { %v989_v11 = vpop.f32.mrb[20].mxu0 }
 0xc05   :  { %v990_v12 = vadd.f32 %v1685_v10, %v989_v11  ;;  %v2081_v13 = vpop.f32.mrb[21].mxu0  ;;  %v1721_v10 = vld [vmem:[%s3392_s0 + $0x2e8] sm:$0xff] }
 0xc06   :  { %v992_v14 = vpop.f32.mrb[22].mxu0  ;;  %v1126_v11 = vpack.c.bf16 %v1721_v10, %v1720_v9  ;;  %v1723_v13 = vld [vmem:[%s3392_s0 + $0x2f8] sm:$0xff]  ;;  %v1222_v10 = vld [vmem:[%s3367_s14 + $0x70] sm:$0xff] }
 0xc07   :  { %v3008_v15 = vadd.f32 %v990_v12, %v845_v54  ;;  %v2082_v16 = vpop.f32.mrb[23].mxu0  ;;  %v1718_v54 = vld [vmem:[%s3392_s0 + $0x2d0] sm:$0xff] }
 0xc08   :  { %v1125_v56 = vpack.c.bf16 %v1719_v55, %v1718_v54  ;;  %v1722_v12 = vld [vmem:[%s3392_s0 + $0x2f0] sm:$0xff]  ;;  %v1299_v54 = vpack.c.bf16 %v1287_v53, %v1286_v51  ;;  %v1216_v55 = vld [vmem:[%s3367_s14 + $0x40] sm:$0xff]  ;;  %v1375_v51 = vpack.c.bf16 %v1365_v50, %v1364_v49  ;;  %v1367_v53 = vld [vmem:[%s3369_s12 + $0x78] sm:$0xff] }
 0xc09   :  { %1000 = vadd.xlane.f32.xlu0 %v3008_v15  ;;  %v1003_v17 = vmul.f32 %v3008_v15, %v3008_v15  ;;  %v1127_v14 = vpack.c.bf16 %v1723_v13, %v1722_v12  ;;  %v1294_v12 = vld [vmem:[%s3368_s10 + $0x70] sm:$0xff]  ;;  %v1295_v13 = vld [vmem:[%s3368_s10 + $0x78] sm:$0xff] }
 0xc0a   :  { %2114 = vmatpush3.bf16.msra.mxu0 %v1125_v56  ;;  %v1217_v56 = vld [vmem:[%s3367_s14 + $0x48] sm:$0xff] }
 0xc0b   :  { %1004 = vadd.xlane.f32.xlu1 %v1003_v17  ;;  %2115 = vmatprep.subr.bf16.mxu0 %v2213_v0 }
 0xc0e   :  { %2116 = vmatpush3.bf16.msra.mxu0 %v1126_v11  ;;  %v1223_v11 = vld [vmem:[%s3367_s14 + $0x78] sm:$0xff] }
 0xc0f   :  { %2117 = vmatprep.subr.bf16.mxu0 %v2213_v0 }
 0xc12   :  { %2118 = vmatpush3.bf16.msra.mxu0 %v1127_v14  ;;  %v1232_v14 = vpack.c.bf16 %v1223_v11, %v1222_v10 }
 0xc13   :  { %2143 = vmatprep.subr.bf16.mxu0 %v2213_v0 }
 0xc96   :  { %v1001_v57 = vpop.xlane.xlu0 %1000 }
 0xc97   :  { %v1002_v58 = vmul.f32 0.03125, %v1001_v57  ;;  %v1288_v57 = vld [vmem:[%s3368_s10 + $0x40] sm:$0xff] }
 0xc98   :  { %v1005_v59 = vpop.xlane.xlu1 %1004 }
 0xc99   :  { %v1007_v60 = vmul.f32 %v1002_v58, %v1002_v58  ;;  %v1006_v61 = vmul.f32 0.03125, %v1005_v59  ;;  %v1009_v1 = vsub.f32 %v3008_v15, %v1002_v58  ;;  %v1707_v15 = vld [vmem:[%s3394_s30 + $0x5] ss:$0 sm:$0xff]  ;;  %v1229_v58 = vpack.c.bf16 %v1217_v56, %v1216_v55  ;;  %v1289_v59 = vld [vmem:[%s3368_s10 + $0x48] sm:$0xff] }
 0xc9a   :  { %v1457_v55 = vld [vmem:[%s3370_s18] sm:$0xff]  ;;  %v1458_v56 = vld [vmem:[%s3370_s18 + $0x8] sm:$0xff] }
 0xc9b   :  { %v1008_v62 = vsub.f32 %v1006_v61, %v1007_v60  ;;  %v1218_v60 = vld [vmem:[%s3367_s14 + $0x50] sm:$0xff]  ;;  %v1219_v61 = vld [vmem:[%s3367_s14 + $0x58] sm:$0xff] }
 0xc9d   :  { %v1010_v63 = vadd.f32 1e-05, %v1008_v62  ;;  %v1300_v62 = vpack.c.bf16 %v1289_v59, %v1288_v57  ;;  %v1459_v57 = vld [vmem:[%s3370_s18 + $0x10] sm:$0xff]  ;;  %v1460_v59 = vld [vmem:[%s3370_s18 + $0x18] sm:$0xff] }
 0xc9f   :  { %2207 = vrsqrt.f32 %v1010_v63  ;;  %v1290_v63 = vld [vmem:[%s3368_s10 + $0x50] sm:$0xff] }
 0xca9   :  { %v2208_v2 = vpop.eup %2207 }
 0xcaa   :  { %v1012_v4 = vmul.f32 %v2208_v2, %v1009_v1  ;;  %v1291_v1 = vld [vmem:[%s3368_s10 + $0x58] sm:$0xff]  ;;  %v1230_v2 = vpack.c.bf16 %v1219_v61, %v1218_v60  ;;  %v1463_v60 = vpack.c.bf16 %v1460_v59, %v1459_v57  ;;  %v1456_v61 = vld [vmem:[%s3371_s1] sm:$0xff] }
 0xcac   :  { %v1019_v6 = vmul.f32 %v1688_v3, %v1012_v4  ;;  %v1301_v3 = vpack.c.bf16 %v1291_v1, %v1290_v63  ;;  %v1220_v4 = vld [vmem:[%s3367_s14 + $0x60] sm:$0xff] }
 0xcad   :  { %v1731_v63 = vld [vmem:[%s3372_s11] ss:$0 sm:$0xff] }
 0xcae   :  { %v1026_v7 = vadd.f32 %v1689_v5, %v1019_v6  ;;  %v1221_v5 = vld [vmem:[%s3367_s14 + $0x68] sm:$0xff]  ;;  %v1292_v6 = vld [vmem:[%s3368_s10 + $0x60] sm:$0xff] }
 0xcb0   :  { %v1044_v8 = vpack.c.bf16 %v1026_v7, %v1026_v7 }
 0xcb2   :  { %2100 = vmatmul.mubr.bf16.vlgmr.msra.gmra.mrb[20].mxu1 %v1044_v8  ;;  %v1231_v8 = vpack.c.bf16 %v1221_v5, %v1220_v4 }
 0xcb3   :  { %2139 = vmatprep.mubr.msk.bf16.mxu1 %vm2214_vm1, %v2213_v0  ;;  %2124 = vmatpush3.bf16.msra.mxu1 %v1225_v26 }
 0xcb4   :  { %2125 = vmatprep.subr.bf16.mxu1 %v2213_v0 }
 0xcb7   :  { %2126 = vmatpush3.bf16.msra.mxu1 %v1226_v40  ;;  %v1358_v40 = vld [vmem:[%s3369_s12 + $0x30] sm:$0xff] }
 0xcb8   :  { %2127 = vmatprep.subr.bf16.mxu1 %v2213_v0 }
 0xcbb   :  { %2128 = vmatpush3.bf16.msra.mxu1 %v1227_v46  ;;  %v1362_v46 = vld [vmem:[%s3369_s12 + $0x50] sm:$0xff] }
 0xcbc   :  { %2129 = vmatprep.subr.bf16.mxu1 %v2213_v0 }
 0xcbf   :  { %2130 = vmatpush3.bf16.msra.mxu1 %v1228_v52  ;;  %v1366_v52 = vld [vmem:[%s3369_s12 + $0x70] sm:$0xff] }
 0xcc0   :  { %2131 = vmatprep.subr.bf16.mxu1 %v2213_v0 }
 0xcc3   :  { %2132 = vmatpush3.bf16.msra.mxu1 %v1229_v58  ;;  %v1462_v58 = vpack.c.bf16 %v1458_v56, %v1457_v55 }
 0xcc4   :  { %2133 = vmatprep.subr.bf16.mxu1 %v2213_v0 }
 0xcc7   :  { %2134 = vmatpush3.bf16.msra.mxu1 %v1230_v2 }
 0xcc8   :  { %2135 = vmatprep.subr.bf16.mxu1 %v2213_v0 }
 0xccb   :  { %2136 = vmatpush3.bf16.msra.mxu1 %v1231_v8  ;;  %v1732_v8 = vld [vmem:[%s3373_s13] ss:$0 sm:$0xff] }
 0xccc   :  { %2137 = vmatprep.subr.bf16.mxu1 %v2213_v0 }
 0xccf   :  { %2138 = vmatpush3.bf16.msra.mxu1 %v1232_v14 }
 0xcd0   :  { %2163 = vmatprep.subr.bf16.mxu1 %v2213_v0 }
 0xd85   :  { %v1095_v16 = vpop.f32.mrb[20].mxu1 }
 0xd86   :  { %v1096_v17 = vadd.f32 %v1707_v15, %v1095_v16  ;;  %v2101_v18 = vpop.f32.mrb[21].mxu1  ;;  %v1303_v15 = vpack.c.bf16 %v1295_v13, %v1294_v12 }
 0xd87   :  { %v1098_v19 = vpop.f32.mrb[22].mxu1 }
 0xd88   :  { %v1101_v20 = vmax.f32 %v1096_v17, 0.0  ;;  %v2102_v21 = vpop.f32.mrb[23].mxu1 }
 0xd8a   :  { %v1119_v22 = vpack.c.bf16 %v1101_v20, %v1101_v20 }
 0xd8c   :  { %2120 = vmatmul.mubr.bf16.vlgmr.msra.gmra.mrb[24].mxu0 %v1119_v22 }
 0xd8d   :  { %2159 = vmatprep.mubr.msk.bf16.mxu0 %vm2214_vm1, %v2213_v0  ;;  %2144 = vmatpush3.bf16.msra.mxu0 %v1296_v28 }
 0xd8e   :  { %2145 = vmatprep.subr.bf16.mxu0 %v2213_v0 }
 0xd91   :  { %2146 = vmatpush3.bf16.msra.mxu0 %v1297_v42  ;;  %v1372_v42 = vpack.c.bf16 %v1359_v41, %v1358_v40 }
 0xd92   :  { %2147 = vmatprep.subr.bf16.mxu0 %v2213_v0 }
 0xd95   :  { %2148 = vmatpush3.bf16.msra.mxu0 %v1298_v48  ;;  %v1374_v48 = vpack.c.bf16 %v1363_v47, %v1362_v46 }
 0xd96   :  { %2149 = vmatprep.subr.bf16.mxu0 %v2213_v0 }
 0xd99   :  { %2150 = vmatpush3.bf16.msra.mxu0 %v1299_v54  ;;  %v1376_v54 = vpack.c.bf16 %v1367_v53, %v1366_v52 }
 0xd9a   :  { %2151 = vmatprep.subr.bf16.mxu0 %v2213_v0 }
 0xd9d   :  { %2152 = vmatpush3.bf16.msra.mxu0 %v1300_v62  ;;  %v1461_v62 = vpack.c.bf16 %v1456_v61, %v1456_v61 }
 0xd9e   :  { %2153 = vmatprep.subr.bf16.mxu0 %v2213_v0 }
 0xda1   :  { %2154 = vmatpush3.bf16.msra.mxu0 %v1301_v3 }
 0xda2   :  { %2155 = vmatprep.subr.bf16.mxu0 %v2213_v0 }
 0xe5f   :  { %v1170_v30 = vpop.f32.mrb[24].mxu0 }
 0xe60   :  { %v1171_v31 = vadd.f32 %v1725_v29, %v1170_v30  ;;  %v2121_v32 = vpop.f32.mrb[25].mxu0  ;;  %v1352_v29 = vld [vmem:[%s3369_s12] sm:$0xff]  ;;  %v1353_v30 = vld [vmem:[%s3369_s12 + $0x8] sm:$0xff] }
 0xe61   :  { %v1173_v33 = vpop.f32.mrb[26].mxu0  ;;  %v1369_v32 = vpack.c.bf16 %v1353_v30, %v1352_v29 }
 0xe62   :  { %v3149_v34 = vadd.f32 %v1171_v31, %v1026_v7  ;;  %v2122_v35 = vpop.f32.mrb[27].mxu0  ;;  %v1293_v7 = vld [vmem:[%s3368_s10 + $0x68] sm:$0xff] }
 0xe63   :  { %v1302_v9 = vpack.c.bf16 %v1293_v7, %v1292_v6  ;;  %v1355_v35 = vld [vmem:[%s3369_s12 + $0x18] sm:$0xff] }
 0xe64   :  { %1181 = vadd.xlane.f32.xlu0 %v3149_v34  ;;  %v1184_v36 = vmul.f32 %v3149_v34, %v3149_v34 }
 0xe65   :  { %2156 = vmatpush3.bf16.msra.mxu0 %v1302_v9 }
 0xe66   :  { %1185 = vadd.xlane.f32.xlu1 %v1184_v36  ;;  %2157 = vmatprep.subr.bf16.mxu0 %v2213_v0 }
 0xe69   :  { %2158 = vmatpush3.bf16.msra.mxu0 %v1303_v15 }
 0xe6a   :  { %2183 = vmatprep.subr.bf16.mxu0 %v2213_v0 }
 0xef1   :  { %v1182_v16 = vpop.xlane.xlu0 %1181 }
 0xef2   :  { %v1183_v17 = vmul.f32 0.03125, %v1182_v16 }
 0xef3   :  { %v1186_v18 = vpop.xlane.xlu1 %1185 }
 0xef4   :  { %v1188_v19 = vmul.f32 %v1183_v17, %v1183_v17  ;;  %v1187_v20 = vmul.f32 0.03125, %v1186_v18  ;;  %v1190_v23 = vsub.f32 %v3149_v34, %v1183_v17  ;;  %v1354_v34 = vld [vmem:[%s3369_s12 + $0x10] sm:$0xff] }
 0xef5   :  { %v1370_v36 = vpack.c.bf16 %v1355_v35, %v1354_v34 }
 0xef6   :  { %v1189_v21 = vsub.f32 %v1187_v20, %v1188_v19  ;;  %v1735_v19 = vld [vmem:[%s3375_s19] ss:$0 sm:$0xff] }
 0xef8   :  { %v1191_v22 = vadd.f32 1e-05, %v1189_v21 }
 0xefa   :  { %2209 = vrsqrt.f32 %v1191_v22 }
 0xf04   :  { %v2210_v24 = vpop.eup %2209 }
 0xf05   :  { %v1193_v26 = vmul.f32 %v2210_v24, %v1190_v23 }
 0xf07   :  { %v1200_v28 = vmul.f32 %v1728_v25, %v1193_v26 }
 0xf09   :  { %v1207_v31 = vadd.f32 %v1729_v27, %v1200_v28 }
 0xf0b   :  { %v1224_v33 = vpack.c.bf16 %v1207_v31, %v1207_v31  ;;  %v1733_v31 = vld [vmem:[%s3377_s16] ss:$0 sm:$0xff] }
 0xf0d   :  { %2140 = vmatmul.mubr.bf16.vlgmr.msra.gmra.mrb[24].mxu1 %v1224_v33  ;;  %2160 = vmatmul.mubr.bf16.vlgmr.msra.gmra.mrb[28].mxu0 %v1224_v33  ;;  %v1734_v33 = vld [vmem:[%s3378_s17] ss:$0 sm:$0xff] }
 0xf0e   :  { %2164 = vmatpush3.bf16.msra.mxu1 %v1369_v32  ;;  %2179 = vmatprep.mubr.msk.bf16.mxu1 %vm2214_vm1, %v2213_v0 }
 0xf0f   :  { %2165 = vmatprep.subr.bf16.mxu1 %v2213_v0  ;;  %2187 = vmatprep.mubr.msk.bf16.mxu0 %vm2214_vm1, %v2213_v0 }
 0xf10   :  { %2184 = vmatpush3.bf16.msra.mxu0 %v1462_v58 }
 0xf11   :  { %2185 = vmatprep.subr.bf16.mxu0 %v2213_v0 }
 0xf12   :  { %2166 = vmatpush3.bf16.msra.mxu1 %v1370_v36 }
 0xf13   :  { %2167 = vmatprep.subr.bf16.mxu1 %v2213_v0 }
 0xf14   :  { %2186 = vmatpush3.bf16.msra.mxu0 %v1463_v60 }
 0xf16   :  { %2168 = vmatpush3.bf16.msra.mxu1 %v1371_v39 }
 0xf17   :  { %2169 = vmatprep.subr.bf16.mxu1 %v2213_v0  ;;  %2188 = vmatmul.mubr.msk.bf16.vlgmr.msra.gmra.mrb[32].mxu0 %vm1471_vm3, %v1461_v62 }
 0xf1a   :  { %2170 = vmatpush3.bf16.msra.mxu1 %v1372_v42 }
 0xf1b   :  { %2171 = vmatprep.subr.bf16.mxu1 %v2213_v0 }
 0xf1e   :  { %2172 = vmatpush3.bf16.msra.mxu1 %v1373_v45 }
 0xf1f   :  { %2173 = vmatprep.subr.bf16.mxu1 %v2213_v0 }
 0xf22   :  { %2174 = vmatpush3.bf16.msra.mxu1 %v1374_v48 }
 0xf23   :  { %2175 = vmatprep.subr.bf16.mxu1 %v2213_v0 }
 0xf26   :  { %2176 = vmatpush3.bf16.msra.mxu1 %v1375_v51 }
 0xf27   :  { %2177 = vmatprep.subr.bf16.mxu1 %v2213_v0  ;;  %v1730_v0 = vld [vmem:[%s3374_s15] ss:$0 sm:$0xff] }
 0xf28   :  { %v2191_v9 = vadd.f32 %v1732_v8, %v1730_v0 }
 0xf2a   :  { %2178 = vmatpush3.bf16.msra.mxu1 %v1376_v54 }
 0xfe0   :  { %v1345_v1 = vpop.f32.mrb[28].mxu0 }
 0xfe1   :  { %v1346_v2 = vadd.f32 %v1731_v63, %v1345_v1  ;;  %v2161_v3 = vpop.f32.mrb[29].mxu0 }
 0xfe2   :  { %v1348_v4 = vpop.f32.mrb[30].mxu0 }
 0xfe3   :  { %v1351_v5 = vmax.f32 %v1346_v2, 0.0  ;;  %v2162_v6 = vpop.f32.mrb[31].mxu0 }
 0xfe5   :  { %v1368_v7 = vpack.c.bf16 %v1351_v5, %v1351_v5 }
 0xfe7   :  { %2180 = vmatmul.mubr.bf16.vlgmr.msra.gmra.mrb[24].mxu1 %v1368_v7 }
 0xfea   :  { %v1509_v16 = vpop.f32.mrb[32].mxu0 }
 0xfeb   :  { %v2189_v17 = vpop.f32.mrb[33].mxu0  ;;  %v1510_v21 = vadd.f32 %v1735_v19, %v1509_v16 }
 0xfec   :  { %v1512_v18 = vpop.f32.mrb[34].mxu0 }
 0xfed   :  { %v2190_v20 = vpop.f32.mrb[35].mxu0  ;;  %1515 = vst [vmem:[%s3376_s21] sm:$0xff] %v1510_v21 }
0x10ba   :  { %v1418_v10 = vpop.f32.mrb[24].mxu1 }
0x10bb   :  { %v2192_v11 = vadd.f32 %v2191_v9, %v1418_v10  ;;  %v2181_v12 = vpop.f32.mrb[25].mxu1 }
0x10bc   :  { %v1421_v13 = vpop.f32.mrb[26].mxu1 }
0x10bd   :  { %1427 = vadd.xlane.f32.xlu0 %v2192_v11  ;;  %v2182_v14 = vpop.f32.mrb[27].mxu1  ;;  %v1431_v15 = vmul.f32 %v2192_v11, %v2192_v11 }
0x10bf   :  { %1432 = vadd.xlane.f32.xlu1 %v1431_v15 }
0x114a   :  { %v1428_v22 = vpop.xlane.xlu0 %1427 }
0x114b   :  { %v1430_v23 = vmul.f32 0.33333334, %v1428_v22 }
0x114c   :  { %v1433_v24 = vpop.xlane.xlu1 %1432 }
0x114d   :  { %v1435_v25 = vmul.f32 %v1430_v23, %v1430_v23  ;;  %v1434_v26 = vmul.f32 0.33333334, %v1433_v24  ;;  %v1437_v29 = vsub.f32 %v2192_v11, %v1430_v23 }
0x114f   :  { %v1436_v27 = vsub.f32 %v1434_v26, %v1435_v25 }
0x1151   :  { %v1438_v28 = vadd.f32 1e-05, %v1436_v27 }
0x1153   :  { %2211 = vrsqrt.f32 %v1438_v28 }
0x115d   :  { %v2212_v30 = vpop.eup %2211 }
0x115e   :  { %v1440_v32 = vmul.f32 %v2212_v30, %v1437_v29 }
0x1160   :  { %v1447_v34 = vmul.f32 %v1733_v31, %v1440_v32 }
0x1162   :  { %v1454_v35 = vadd.f32 %v1734_v33, %v1447_v34 }
0x1164   :  { %1455 = vst [vmem:[%s3379_s20] sm:$0xff] %v1454_v35 }

</bundles_post_ra>
